<compile_context>
chip_gen: v7x
topology: tpu7x:2x2x1
jax: 0.10.0
libtpu: 0.0.40
codegen_flags: <defaults>
</compile_context>

<pallas_src>
import functools

import jax
import jax.numpy as jnp
from jax import lax
from jax.experimental import pallas as pl
from jax.experimental.pallas import tpu as pltpu


def _round_up(x, m):
    return ((x + m - 1) // m) * m


def _vmem_capacity_bytes():
    try:
        return int(pltpu.get_tpu_info().vmem_capacity_bytes)
    except Exception:
        return 64 * 2 ** 20          # conservative fallback (v7x per-TC VMEM)


def spatial_attention_kernel(x_ref, w_ref, o_ref, avg_sc, max_sc,
                             *, k, H, W, base, L):
    """One grid step processes `nb` images, batched in the sublane dim.

    x_ref, o_ref : (nb, C, HW_pad) VMEM, lane-dense (HW_pad is the lane dim).
    w_ref        : (2*k*k,) f32 SMEM, conv taps read as scalars.
    avg_sc/max_sc: (nb, L) f32 VMEM scratch.  Lanes [base, base+HW) hold the
                   flattened avg / max map; [0, base) and [base+HW, L) stay
                   zero and implement the conv's SAME zero padding for rows
                   that fall outside the image.
    """
    nb, C, HW_pad = x_ref.shape
    HW = H * W
    p = k // 2

    # Zero only the padding lanes of the stat scratch (the interior is fully
    # overwritten below).  Done unconditionally every step: with a "parallel"
    # batch axis each core owns its scratch, and this is only a few KiB.
    if base > 0:
        avg_sc[:, 0:base] = jnp.zeros((nb, base), jnp.float32)
        max_sc[:, 0:base] = jnp.zeros((nb, base), jnp.float32)
    if L > base + HW:
        avg_sc[:, base + HW:L] = jnp.zeros((nb, L - base - HW), jnp.float32)
        max_sc[:, base + HW:L] = jnp.zeros((nb, L - base - HW), jnp.float32)

    # Hoist SMEM scalar weight reads and per-dx column masks (JAX does not
    # CSE these if left inside the tap loops).
    wv = [[[w_ref[c * k * k + dy * k + dx] for dx in range(k)]
           for dy in range(k)] for c in range(2)]
    col = lax.broadcasted_iota(jnp.int32, (1, HW), 1) % W
    col_mask = []
    for dx in range(k):
        s = dx - p
        if s == 0:
            col_mask.append(None)
        elif s > 0:
            col_mask.append(col < (W - s))       # kills cols that would wrap right
        else:
            col_mask.append(col >= (-s))         # kills cols that would wrap left

    # ---- fused channel mean / max: one pass over C, batched over nb --------
    x0 = x_ref[:, 0, :]
    run_sum = x0.astype(jnp.float32)
    run_max = x0
    for c in range(1, C):
        xc = x_ref[:, c, :]
        run_sum = run_sum + xc.astype(jnp.float32)
        run_max = jnp.maximum(run_max, xc)
    avg = run_sum * jnp.float32(1.0 / C)
    mx = run_max.astype(jnp.float32)
    if HW_pad != HW:
        avg = avg[:, :HW]
        mx = mx[:, :HW]
    avg_sc[:, base:base + HW] = avg
    max_sc[:, base:base + HW] = mx

    # ---- k x k conv (2 -> 1 channel) on the flat zero-padded stat maps -----
    # out(i) = sum_{c,dy,dx} w[c,dy,dx] * stat[c, base + i + (dy-p)*W + (dx-p)]
    # One lane slab per (c, dy) (2*k loads), folded into k per-dx partial
    # sums; the dx shift is a single XLU lane roll per dx afterwards.
    # TODO(synk): chunk the lane dim of this accumulation for very large H*W
    # (> ~2k lanes) to bound live vregs; not needed at these sizes.
    partial = [jnp.zeros((nb, HW), jnp.float32) for _ in range(k)]
    for c, sref in enumerate((avg_sc, max_sc)):
        for dy in range(k):
            off = base + (dy - p) * W
            slab = sref[:, off:off + HW]
            for dx in range(k):
                partial[dx] = partial[dx] + wv[c][dy][dx] * slab

    acc = None
    for dx in range(k):
        t = partial[dx]
        if dx != p:
            t = pltpu.roll(t, shift=(-(dx - p)) % HW, axis=1)
        if col_mask[dx] is not None:
            t = jnp.where(col_mask[dx], t, 0.0)
        acc = t if acc is None else acc + t

    # ---- sigmoid(x) = 0.5*tanh(0.5*x) + 0.5 (one EUP transcendental) -------
    att = 0.5 * jnp.tanh(0.5 * acc) + 0.5               # (nb, HW) f32

    # ---- rescale x (broadcast over channels); lane-dense store -------------
    att_cast = att.astype(o_ref.dtype)                  # bf16 mul path on v6e/v7x
    if HW_pad == HW:
        o_ref[...] = x_ref[...] * att_cast[:, None, :]
    else:
        # Padding lanes of the output block are never read by the wrapper.
        o_ref[:, :, :HW] = x_ref[:, :, :HW] * att_cast[:, None, :]


def spatial_attention(x, w, *, block_batch=None):
    """CBAM SpatialAttention: x * sigmoid(conv2d(cat[mean_c(x), max_c(x)]))."""
    N, C, H, W = x.shape
    k = w.shape[-1]
    assert w.shape == (1, 2, k, k), "conv weight must have shape (1, 2, k, k)"
    assert k % 2 == 1, "only odd kernel sizes supported (CBAM uses 3 or 7)"
    HW = H * W
    HW_pad = _round_up(HW, 128)
    p = k // 2

    # Lane-dense view of the input; the reshape is a free bitcast, padding is
    # only materialized when H*W is not already a multiple of 128.
    x_flat = x.reshape(N, C, HW)
    if HW_pad != HW:
        x_flat = jnp.pad(x_flat, ((0, 0), (0, 0), (0, HW_pad - HW)))
    w_flat = w.reshape(-1).astype(jnp.float32)           # (2*k*k,) SMEM scalars

    # Flat zero-padded stat scratch layout; `base` is lane-aligned so the big
    # stat stores are unmasked, and the zero borders absorb out-of-range rows.
    base = _round_up(p * W + p, 128)
    L = _round_up(base + HW + p * W + p, 128)

    itemsize = jnp.dtype(x.dtype).itemsize
    per_image_bytes = C * HW_pad * itemsize
    scratch_per_image = 2 * L * 4

    if block_batch is None:
        cap = _vmem_capacity_bytes()
        # ~2 MiB of input per grid step hides the ~0.35 us per-step overhead.
        nb_target = max(1, (2 << 20) // per_image_bytes)
        # Double-buffered in+out blocks + scratch within ~60% of VMEM.
        nb_vmem = max(1, int(0.6 * cap) //
                      (4 * per_image_bytes + scratch_per_image))
        # Keep >= 4 grid steps when the batch allows (v7x has 2 TensorCores).
        nb_grid = max(1, N // 4) if N >= 4 else N
        nb_cap = max(1, min(nb_target, nb_vmem, nb_grid, N))
        divisors = [d for d in range(1, N + 1) if N % d == 0 and d <= nb_cap]
        mult8 = [d for d in divisors if d % 8 == 0]
        nb = max(mult8) if mult8 else max(divisors)
    else:
        nb = block_batch
        assert N % nb == 0
    grid = (N // nb,)

    block_bytes = nb * per_image_bytes
    scratch_bytes = nb * scratch_per_image
    vmem_limit = int(min(_vmem_capacity_bytes(),
                         max(32 << 20,
                             4 * block_bytes + scratch_bytes + (4 << 20))))

    cost = pl.CostEstimate(
        flops=int(N * HW * (4 * C + 4 * k * k + 8)),
        transcendentals=int(N * HW),
        bytes_accessed=int(2 * N * C * HW_pad * itemsize))

    out_flat = pl.pallas_call(
        functools.partial(spatial_attention_kernel,
                          k=k, H=H, W=W, base=base, L=L),
        out_shape=jax.ShapeDtypeStruct((N, C, HW_pad), x.dtype),
        grid_spec=pltpu.PrefetchScalarGridSpec(
            num_scalar_prefetch=0,
            grid=grid,
            in_specs=[
                pl.BlockSpec((nb, C, HW_pad), lambda n: (n, 0, 0)),
                pl.BlockSpec(memory_space=pltpu.MemorySpace.SMEM),
            ],
            out_specs=pl.BlockSpec((nb, C, HW_pad), lambda n: (n, 0, 0)),
            scratch_shapes=[pltpu.VMEM((nb, L), jnp.float32),
                            pltpu.VMEM((nb, L), jnp.float32)],
        ),
        compiler_params=pltpu.CompilerParams(
            dimension_semantics=("parallel",),
            vmem_limit_bytes=vmem_limit),
        cost_estimate=cost,
    )(x_flat, w_flat)

    out = out_flat[:, :, :HW] if HW_pad != HW else out_flat
    return out.reshape(N, C, H, W)


def spatial_attention_ref(x, w):
    """Pure-JAX reference mirroring the PyTorch forward."""
    avg = jnp.mean(x, axis=1, keepdims=True)
    mx = jnp.max(x, axis=1, keepdims=True)
    cat = jnp.concatenate([avg, mx], axis=1)
    conv = lax.conv_general_dilated(
        cat, w, window_strides=(1, 1), padding="SAME",
        dimension_numbers=("NCHW", "OIHW", "NCHW"))
    att = jax.nn.sigmoid(conv)
    return x * att


if __name__ == "__main__":
    key = jax.random.PRNGKey(0)
    kx, kw = jax.random.split(key)

    N, C, H, W = 2, 4, 16, 16
    kernel_size = 7

    x = jax.random.normal(kx, (N, C, H, W), dtype=jnp.float32)
    # Deterministic stand-in for Conv2d(2, 1, 7, bias=False) weights
    # (kaiming-uniform-ish scale: bound = 1/sqrt(fan_in) = 1/sqrt(2*7*7)).
    bound = 1.0 / jnp.sqrt(2.0 * kernel_size * kernel_size)
    w = jax.random.uniform(kw, (1, 2, kernel_size, kernel_size),
                           dtype=jnp.float32, minval=-bound, maxval=bound)

    out = spatial_attention(x, w)
    out = jax.block_until_ready(out)

    ref = spatial_attention_ref(x, w)
    assert out.shape == ref.shape and out.dtype == ref.dtype
    err = float(jnp.max(jnp.abs(out - ref)))
    # Exact-form sigmoid (tanh) -> only conv summation-order differences left.
    assert jnp.allclose(out, ref, atol=5e-5, rtol=5e-5), err

    print("KERNEL_OK")
</pallas_src>

<mosaic_0001>
module attributes {stable_mosaic.version = 11 : i64} {
  func.func @spatial_attention_kernel(%arg0: i32, %arg1: memref<2x4x256xf32, #tpu.memory_space<vmem>>, %arg2: memref<98xf32, #tpu.memory_space<smem>>, %arg3: memref<2x4x256xf32, #tpu.memory_space<vmem>>, %arg4: memref<2x512xf32, #tpu.memory_space<vmem>>, %arg5: memref<2x512xf32, #tpu.memory_space<vmem>>) attributes {dimension_semantics = [#tpu.dimension_semantics<parallel>], iteration_bounds = array<i64: 1>, scalar_prefetch = 0 : i64, scratch_operands = 2 : i64, tpu.core_type = #tpu.core_type<tc>, window_params = [{transform_indices = @transform_0, window_bounds = array<i64: 2, 4, 256>}, {transform_indices = @transform_1, window_bounds = array<i64: 98>}, {transform_indices = @transform_2, window_bounds = array<i64: 2, 4, 256>}]} {
    %cst = arith.constant 0.000000e+00 : f32
    %0 = vector.broadcast %cst : f32 to vector<2x128xf32>
    %c0 = arith.constant 0 : index
    %c0_0 = arith.constant 0 : index
    %1 = vector.load %arg4[%c0, %c0_0] : memref<2x512xf32, #tpu.memory_space<vmem>>, vector<2x128xf32>
    tpu.vector_store %arg4[%c0, %c0_0], %0 {strides = array<i32>} : memref<2x512xf32, #tpu.memory_space<vmem>>, vector<2x128xf32>,
    %cst_1 = arith.constant 0.000000e+00 : f32
    %2 = vector.broadcast %cst_1 : f32 to vector<2x128xf32>
    %c0_2 = arith.constant 0 : index
    %c0_3 = arith.constant 0 : index
    %3 = vector.load %arg5[%c0_2, %c0_3] : memref<2x512xf32, #tpu.memory_space<vmem>>, vector<2x128xf32>
    tpu.vector_store %arg5[%c0_2, %c0_3], %2 {strides = array<i32>} : memref<2x512xf32, #tpu.memory_space<vmem>>, vector<2x128xf32>,
    %cst_4 = arith.constant 0.000000e+00 : f32
    %4 = vector.broadcast %cst_4 : f32 to vector<2x128xf32>
    %c0_5 = arith.constant 0 : index
    %c384 = arith.constant 384 : index
    %5 = vector.load %arg4[%c0_5, %c384] : memref<2x512xf32, #tpu.memory_space<vmem>>, vector<2x128xf32>
    tpu.vector_store %arg4[%c0_5, %c384], %4 {strides = array<i32>} : memref<2x512xf32, #tpu.memory_space<vmem>>, vector<2x128xf32>,
    %cst_6 = arith.constant 0.000000e+00 : f32
    %6 = vector.broadcast %cst_6 : f32 to vector<2x128xf32>
    %c0_7 = arith.constant 0 : index
    %c384_8 = arith.constant 384 : index
    %7 = vector.load %arg5[%c0_7, %c384_8] : memref<2x512xf32, #tpu.memory_space<vmem>>, vector<2x128xf32>
    tpu.vector_store %arg5[%c0_7, %c384_8], %6 {strides = array<i32>} : memref<2x512xf32, #tpu.memory_space<vmem>>, vector<2x128xf32>,
    %c0_9 = arith.constant 0 : index
    %8 = memref.load %arg2[%c0_9] : memref<98xf32, #tpu.memory_space<smem>>
    %c1 = arith.constant 1 : index
    %9 = memref.load %arg2[%c1] : memref<98xf32, #tpu.memory_space<smem>>
    %c2 = arith.constant 2 : index
    %10 = memref.load %arg2[%c2] : memref<98xf32, #tpu.memory_space<smem>>
    %c3 = arith.constant 3 : index
    %11 = memref.load %arg2[%c3] : memref<98xf32, #tpu.memory_space<smem>>
    %c4 = arith.constant 4 : index
    %12 = memref.load %arg2[%c4] : memref<98xf32, #tpu.memory_space<smem>>
    %c5 = arith.constant 5 : index
    %13 = memref.load %arg2[%c5] : memref<98xf32, #tpu.memory_space<smem>>
    %c6 = arith.constant 6 : index
    %14 = memref.load %arg2[%c6] : memref<98xf32, #tpu.memory_space<smem>>
    %c7 = arith.constant 7 : index
    %15 = memref.load %arg2[%c7] : memref<98xf32, #tpu.memory_space<smem>>
    %c8 = arith.constant 8 : index
    %16 = memref.load %arg2[%c8] : memref<98xf32, #tpu.memory_space<smem>>
    %c9 = arith.constant 9 : index
    %17 = memref.load %arg2[%c9] : memref<98xf32, #tpu.memory_space<smem>>
    %c10 = arith.constant 10 : index
    %18 = memref.load %arg2[%c10] : memref<98xf32, #tpu.memory_space<smem>>
    %c11 = arith.constant 11 : index
    %19 = memref.load %arg2[%c11] : memref<98xf32, #tpu.memory_space<smem>>
    %c12 = arith.constant 12 : index
    %20 = memref.load %arg2[%c12] : memref<98xf32, #tpu.memory_space<smem>>
    %c13 = arith.constant 13 : index
    %21 = memref.load %arg2[%c13] : memref<98xf32, #tpu.memory_space<smem>>
    %c14 = arith.constant 14 : index
    %22 = memref.load %arg2[%c14] : memref<98xf32, #tpu.memory_space<smem>>
    %c15 = arith.constant 15 : index
    %23 = memref.load %arg2[%c15] : memref<98xf32, #tpu.memory_space<smem>>
    %c16 = arith.constant 16 : index
    %24 = memref.load %arg2[%c16] : memref<98xf32, #tpu.memory_space<smem>>
    %c17 = arith.constant 17 : index
    %25 = memref.load %arg2[%c17] : memref<98xf32, #tpu.memory_space<smem>>
    %c18 = arith.constant 18 : index
    %26 = memref.load %arg2[%c18] : memref<98xf32, #tpu.memory_space<smem>>
    %c19 = arith.constant 19 : index
    %27 = memref.load %arg2[%c19] : memref<98xf32, #tpu.memory_space<smem>>
    %c20 = arith.constant 20 : index
    %28 = memref.load %arg2[%c20] : memref<98xf32, #tpu.memory_space<smem>>
    %c21 = arith.constant 21 : index
    %29 = memref.load %arg2[%c21] : memref<98xf32, #tpu.memory_space<smem>>
    %c22 = arith.constant 22 : index
    %30 = memref.load %arg2[%c22] : memref<98xf32, #tpu.memory_space<smem>>
    %c23 = arith.constant 23 : index
    %31 = memref.load %arg2[%c23] : memref<98xf32, #tpu.memory_space<smem>>
    %c24 = arith.constant 24 : index
    %32 = memref.load %arg2[%c24] : memref<98xf32, #tpu.memory_space<smem>>
    %c25 = arith.constant 25 : index
    %33 = memref.load %arg2[%c25] : memref<98xf32, #tpu.memory_space<smem>>
    %c26 = arith.constant 26 : index
    %34 = memref.load %arg2[%c26] : memref<98xf32, #tpu.memory_space<smem>>
    %c27 = arith.constant 27 : index
    %35 = memref.load %arg2[%c27] : memref<98xf32, #tpu.memory_space<smem>>
    %c28 = arith.constant 28 : index
    %36 = memref.load %arg2[%c28] : memref<98xf32, #tpu.memory_space<smem>>
    %c29 = arith.constant 29 : index
    %37 = memref.load %arg2[%c29] : memref<98xf32, #tpu.memory_space<smem>>
    %c30 = arith.constant 30 : index
    %38 = memref.load %arg2[%c30] : memref<98xf32, #tpu.memory_space<smem>>
    %c31 = arith.constant 31 : index
    %39 = memref.load %arg2[%c31] : memref<98xf32, #tpu.memory_space<smem>>
    %c32 = arith.constant 32 : index
    %40 = memref.load %arg2[%c32] : memref<98xf32, #tpu.memory_space<smem>>
    %c33 = arith.constant 33 : index
    %41 = memref.load %arg2[%c33] : memref<98xf32, #tpu.memory_space<smem>>
    %c34 = arith.constant 34 : index
    %42 = memref.load %arg2[%c34] : memref<98xf32, #tpu.memory_space<smem>>
    %c35 = arith.constant 35 : index
    %43 = memref.load %arg2[%c35] : memref<98xf32, #tpu.memory_space<smem>>
    %c36 = arith.constant 36 : index
    %44 = memref.load %arg2[%c36] : memref<98xf32, #tpu.memory_space<smem>>
    %c37 = arith.constant 37 : index
    %45 = memref.load %arg2[%c37] : memref<98xf32, #tpu.memory_space<smem>>
    %c38 = arith.constant 38 : index
    %46 = memref.load %arg2[%c38] : memref<98xf32, #tpu.memory_space<smem>>
    %c39 = arith.constant 39 : index
    %47 = memref.load %arg2[%c39] : memref<98xf32, #tpu.memory_space<smem>>
    %c40 = arith.constant 40 : index
    %48 = memref.load %arg2[%c40] : memref<98xf32, #tpu.memory_space<smem>>
    %c41 = arith.constant 41 : index
    %49 = memref.load %arg2[%c41] : memref<98xf32, #tpu.memory_space<smem>>
    %c42 = arith.constant 42 : index
    %50 = memref.load %arg2[%c42] : memref<98xf32, #tpu.memory_space<smem>>
    %c43 = arith.constant 43 : index
    %51 = memref.load %arg2[%c43] : memref<98xf32, #tpu.memory_space<smem>>
    %c44 = arith.constant 44 : index
    %52 = memref.load %arg2[%c44] : memref<98xf32, #tpu.memory_space<smem>>
    %c45 = arith.constant 45 : index
    %53 = memref.load %arg2[%c45] : memref<98xf32, #tpu.memory_space<smem>>
    %c46 = arith.constant 46 : index
    %54 = memref.load %arg2[%c46] : memref<98xf32, #tpu.memory_space<smem>>
    %c47 = arith.constant 47 : index
    %55 = memref.load %arg2[%c47] : memref<98xf32, #tpu.memory_space<smem>>
    %c48 = arith.constant 48 : index
    %56 = memref.load %arg2[%c48] : memref<98xf32, #tpu.memory_space<smem>>
    %c49 = arith.constant 49 : index
    %57 = memref.load %arg2[%c49] : memref<98xf32, #tpu.memory_space<smem>>
    %c50 = arith.constant 50 : index
    %58 = memref.load %arg2[%c50] : memref<98xf32, #tpu.memory_space<smem>>
    %c51 = arith.constant 51 : index
    %59 = memref.load %arg2[%c51] : memref<98xf32, #tpu.memory_space<smem>>
    %c52 = arith.constant 52 : index
    %60 = memref.load %arg2[%c52] : memref<98xf32, #tpu.memory_space<smem>>
    %c53 = arith.constant 53 : index
    %61 = memref.load %arg2[%c53] : memref<98xf32, #tpu.memory_space<smem>>
    %c54 = arith.constant 54 : index
    %62 = memref.load %arg2[%c54] : memref<98xf32, #tpu.memory_space<smem>>
    %c55 = arith.constant 55 : index
    %63 = memref.load %arg2[%c55] : memref<98xf32, #tpu.memory_space<smem>>
    %c56 = arith.constant 56 : index
    %64 = memref.load %arg2[%c56] : memref<98xf32, #tpu.memory_space<smem>>
    %c57 = arith.constant 57 : index
    %65 = memref.load %arg2[%c57] : memref<98xf32, #tpu.memory_space<smem>>
    %c58 = arith.constant 58 : index
    %66 = memref.load %arg2[%c58] : memref<98xf32, #tpu.memory_space<smem>>
    %c59 = arith.constant 59 : index
    %67 = memref.load %arg2[%c59] : memref<98xf32, #tpu.memory_space<smem>>
    %c60 = arith.constant 60 : index
    %68 = memref.load %arg2[%c60] : memref<98xf32, #tpu.memory_space<smem>>
    %c61 = arith.constant 61 : index
    %69 = memref.load %arg2[%c61] : memref<98xf32, #tpu.memory_space<smem>>
    %c62 = arith.constant 62 : index
    %70 = memref.load %arg2[%c62] : memref<98xf32, #tpu.memory_space<smem>>
    %c63 = arith.constant 63 : index
    %71 = memref.load %arg2[%c63] : memref<98xf32, #tpu.memory_space<smem>>
    %c64 = arith.constant 64 : index
    %72 = memref.load %arg2[%c64] : memref<98xf32, #tpu.memory_space<smem>>
    %c65 = arith.constant 65 : index
    %73 = memref.load %arg2[%c65] : memref<98xf32, #tpu.memory_space<smem>>
    %c66 = arith.constant 66 : index
    %74 = memref.load %arg2[%c66] : memref<98xf32, #tpu.memory_space<smem>>
    %c67 = arith.constant 67 : index
    %75 = memref.load %arg2[%c67] : memref<98xf32, #tpu.memory_space<smem>>
    %c68 = arith.constant 68 : index
    %76 = memref.load %arg2[%c68] : memref<98xf32, #tpu.memory_space<smem>>
    %c69 = arith.constant 69 : index
    %77 = memref.load %arg2[%c69] : memref<98xf32, #tpu.memory_space<smem>>
    %c70 = arith.constant 70 : index
    %78 = memref.load %arg2[%c70] : memref<98xf32, #tpu.memory_space<smem>>
    %c71 = arith.constant 71 : index
    %79 = memref.load %arg2[%c71] : memref<98xf32, #tpu.memory_space<smem>>
    %c72 = arith.constant 72 : index
    %80 = memref.load %arg2[%c72] : memref<98xf32, #tpu.memory_space<smem>>
    %c73 = arith.constant 73 : index
    %81 = memref.load %arg2[%c73] : memref<98xf32, #tpu.memory_space<smem>>
    %c74 = arith.constant 74 : index
    %82 = memref.load %arg2[%c74] : memref<98xf32, #tpu.memory_space<smem>>
    %c75 = arith.constant 75 : index
    %83 = memref.load %arg2[%c75] : memref<98xf32, #tpu.memory_space<smem>>
    %c76 = arith.constant 76 : index
    %84 = memref.load %arg2[%c76] : memref<98xf32, #tpu.memory_space<smem>>
    %c77 = arith.constant 77 : index
    %85 = memref.load %arg2[%c77] : memref<98xf32, #tpu.memory_space<smem>>
    %c78 = arith.constant 78 : index
    %86 = memref.load %arg2[%c78] : memref<98xf32, #tpu.memory_space<smem>>
    %c79 = arith.constant 79 : index
    %87 = memref.load %arg2[%c79] : memref<98xf32, #tpu.memory_space<smem>>
    %c80 = arith.constant 80 : index
    %88 = memref.load %arg2[%c80] : memref<98xf32, #tpu.memory_space<smem>>
    %c81 = arith.constant 81 : index
    %89 = memref.load %arg2[%c81] : memref<98xf32, #tpu.memory_space<smem>>
    %c82 = arith.constant 82 : index
    %90 = memref.load %arg2[%c82] : memref<98xf32, #tpu.memory_space<smem>>
    %c83 = arith.constant 83 : index
    %91 = memref.load %arg2[%c83] : memref<98xf32, #tpu.memory_space<smem>>
    %c84 = arith.constant 84 : index
    %92 = memref.load %arg2[%c84] : memref<98xf32, #tpu.memory_space<smem>>
    %c85 = arith.constant 85 : index
    %93 = memref.load %arg2[%c85] : memref<98xf32, #tpu.memory_space<smem>>
    %c86 = arith.constant 86 : index
    %94 = memref.load %arg2[%c86] : memref<98xf32, #tpu.memory_space<smem>>
    %c87 = arith.constant 87 : index
    %95 = memref.load %arg2[%c87] : memref<98xf32, #tpu.memory_space<smem>>
    %c88 = arith.constant 88 : index
    %96 = memref.load %arg2[%c88] : memref<98xf32, #tpu.memory_space<smem>>
    %c89 = arith.constant 89 : index
    %97 = memref.load %arg2[%c89] : memref<98xf32, #tpu.memory_space<smem>>
    %c90 = arith.constant 90 : index
    %98 = memref.load %arg2[%c90] : memref<98xf32, #tpu.memory_space<smem>>
    %c91 = arith.constant 91 : index
    %99 = memref.load %arg2[%c91] : memref<98xf32, #tpu.memory_space<smem>>
    %c92 = arith.constant 92 : index
    %100 = memref.load %arg2[%c92] : memref<98xf32, #tpu.memory_space<smem>>
    %c93 = arith.constant 93 : index
    %101 = memref.load %arg2[%c93] : memref<98xf32, #tpu.memory_space<smem>>
    %c94 = arith.constant 94 : index
    %102 = memref.load %arg2[%c94] : memref<98xf32, #tpu.memory_space<smem>>
    %c95 = arith.constant 95 : index
    %103 = memref.load %arg2[%c95] : memref<98xf32, #tpu.memory_space<smem>>
    %c96 = arith.constant 96 : index
    %104 = memref.load %arg2[%c96] : memref<98xf32, #tpu.memory_space<smem>>
    %c97 = arith.constant 97 : index
    %105 = memref.load %arg2[%c97] : memref<98xf32, #tpu.memory_space<smem>>
    %106 = tpu.iota {dimensions = array<i32: 1>} : vector<1x256xi32>
    %c16_i32 = arith.constant 16 : i32
    %c0_i32 = arith.constant 0 : i32
    %107 = arith.cmpi eq, %c16_i32, %c0_i32 : i32
    %c1_i32 = arith.constant 1 : i32
    %108 = arith.select %107, %c1_i32, %c16_i32 : i32
    %109 = vector.broadcast %108 : i32 to vector<1x256xi32>
    %110 = arith.remsi %106, %109 : vector<1x256xi32>
    %c0_i32_10 = arith.constant 0 : i32
    %111 = vector.broadcast %c0_i32_10 : i32 to vector<1x256xi32>
    %112 = arith.cmpi ne, %110, %111 : vector<1x256xi32>
    %c0_i32_11 = arith.constant 0 : i32
    %113 = vector.broadcast %c0_i32_11 : i32 to vector<1x256xi32>
    %114 = arith.cmpi slt, %110, %113 : vector<1x256xi32>
    %c0_i32_12 = arith.constant 0 : i32
    %115 = arith.cmpi slt, %108, %c0_i32_12 : i32
    %116 = vector.broadcast %115 : i1 to vector<1x256xi1>
    %117 = vector.broadcast %116 : vector<1x256xi1> to vector<1x256xi1>
    %118 = arith.xori %114, %117 : vector<1x256xi1>
    %119 = arith.andi %118, %112 : vector<1x256xi1>
    %120 = vector.broadcast %108 : i32 to vector<1x256xi32>
    %121 = arith.addi %110, %120 : vector<1x256xi32>
    %122 = arith.select %119, %121, %110 : vector<1x256xi1>, vector<1x256xi32>
    %c3_i32 = arith.constant 3 : i32
    %123 = vector.broadcast %c3_i32 : i32 to vector<1x256xi32>
    %124 = arith.cmpi sge, %122, %123 : vector<1x256xi32>
    %c2_i32 = arith.constant 2 : i32
    %125 = vector.broadcast %c2_i32 : i32 to vector<1x256xi32>
    %126 = arith.cmpi sge, %122, %125 : vector<1x256xi32>
    %c1_i32_13 = arith.constant 1 : i32
    %127 = vector.broadcast %c1_i32_13 : i32 to vector<1x256xi32>
    %128 = arith.cmpi sge, %122, %127 : vector<1x256xi32>
    %c15_i32 = arith.constant 15 : i32
    %129 = vector.broadcast %c15_i32 : i32 to vector<1x256xi32>
    %130 = arith.cmpi slt, %122, %129 : vector<1x256xi32>
    %c14_i32 = arith.constant 14 : i32
    %131 = vector.broadcast %c14_i32 : i32 to vector<1x256xi32>
    %132 = arith.cmpi slt, %122, %131 : vector<1x256xi32>
    %c13_i32 = arith.constant 13 : i32
    %133 = vector.broadcast %c13_i32 : i32 to vector<1x256xi32>
    %134 = arith.cmpi slt, %122, %133 : vector<1x256xi32>
    %c0_14 = arith.constant 0 : index
    %c0_15 = arith.constant 0 : index
    %c0_16 = arith.constant 0 : index
    %135 = vector.load %arg1[%c0_14, %c0_15, %c0_16] : memref<2x4x256xf32, #tpu.memory_space<vmem>>, vector<2x1x256xf32>
    %136 = vector.shape_cast %135 : vector<2x1x256xf32> to vector<2x256xf32>
    %c0_17 = arith.constant 0 : index
    %c1_18 = arith.constant 1 : index
    %c0_19 = arith.constant 0 : index
    %137 = vector.load %arg1[%c0_17, %c1_18, %c0_19] : memref<2x4x256xf32, #tpu.memory_space<vmem>>, vector<2x1x256xf32>
    %138 = vector.shape_cast %137 : vector<2x1x256xf32> to vector<2x256xf32>
    %139 = arith.addf %136, %138 : vector<2x256xf32>
    %140 = arith.maximumf %136, %138 : vector<2x256xf32>
    %c0_20 = arith.constant 0 : index
    %c2_21 = arith.constant 2 : index
    %c0_22 = arith.constant 0 : index
    %141 = vector.load %arg1[%c0_20, %c2_21, %c0_22] : memref<2x4x256xf32, #tpu.memory_space<vmem>>, vector<2x1x256xf32>
    %142 = vector.shape_cast %141 : vector<2x1x256xf32> to vector<2x256xf32>
    %143 = arith.addf %139, %142 : vector<2x256xf32>
    %144 = arith.maximumf %140, %142 : vector<2x256xf32>
    %c0_23 = arith.constant 0 : index
    %c3_24 = arith.constant 3 : index
    %c0_25 = arith.constant 0 : index
    %145 = vector.load %arg1[%c0_23, %c3_24, %c0_25] : memref<2x4x256xf32, #tpu.memory_space<vmem>>, vector<2x1x256xf32>
    %146 = vector.shape_cast %145 : vector<2x1x256xf32> to vector<2x256xf32>
    %147 = arith.addf %143, %146 : vector<2x256xf32>
    %148 = arith.maximumf %144, %146 : vector<2x256xf32>
    %cst_26 = arith.constant 2.500000e-01 : f32
    %149 = vector.broadcast %cst_26 : f32 to vector<2x256xf32>
    %150 = arith.mulf %147, %149 : vector<2x256xf32>
    %c0_27 = arith.constant 0 : index
    %c128 = arith.constant 128 : index
    %151 = vector.load %arg4[%c0_27, %c128] : memref<2x512xf32, #tpu.memory_space<vmem>>, vector<2x256xf32>
    tpu.vector_store %arg4[%c0_27, %c128], %150 {strides = array<i32>} : memref<2x512xf32, #tpu.memory_space<vmem>>, vector<2x256xf32>,
    %c0_28 = arith.constant 0 : index
    %c128_29 = arith.constant 128 : index
    %152 = vector.load %arg5[%c0_28, %c128_29] : memref<2x512xf32, #tpu.memory_space<vmem>>, vector<2x256xf32>
    tpu.vector_store %arg5[%c0_28, %c128_29], %148 {strides = array<i32>} : memref<2x512xf32, #tpu.memory_space<vmem>>, vector<2x256xf32>,
    %cst_30 = arith.constant 0.000000e+00 : f32
    %153 = vector.broadcast %cst_30 : f32 to vector<2x256xf32>
    %cst_31 = arith.constant 0.000000e+00 : f32
    %154 = vector.broadcast %cst_31 : f32 to vector<2x256xf32>
    %cst_32 = arith.constant 0.000000e+00 : f32
    %155 = vector.broadcast %cst_32 : f32 to vector<2x256xf32>
    %cst_33 = arith.constant 0.000000e+00 : f32
    %156 = vector.broadcast %cst_33 : f32 to vector<2x256xf32>
    %cst_34 = arith.constant 0.000000e+00 : f32
    %157 = vector.broadcast %cst_34 : f32 to vector<2x256xf32>
    %cst_35 = arith.constant 0.000000e+00 : f32
    %158 = vector.broadcast %cst_35 : f32 to vector<2x256xf32>
    %cst_36 = arith.constant 0.000000e+00 : f32
    %159 = vector.broadcast %cst_36 : f32 to vector<2x256xf32>
    %c0_37 = arith.constant 0 : index
    %c80_38 = arith.constant 80 : index
    %160 = vector.load %arg4[%c0_37, %c80_38] : memref<2x512xf32, #tpu.memory_space<vmem>>, vector<2x256xf32>
    %161 = vector.broadcast %8 : f32 to vector<2x256xf32>
    %162 = arith.mulf %161, %160 : vector<2x256xf32>
    %163 = arith.addf %153, %162 : vector<2x256xf32>
    %164 = vector.broadcast %9 : f32 to vector<2x256xf32>
    %165 = arith.mulf %164, %160 : vector<2x256xf32>
    %166 = arith.addf %154, %165 : vector<2x256xf32>
    %167 = vector.broadcast %10 : f32 to vector<2x256xf32>
    %168 = arith.mulf %167, %160 : vector<2x256xf32>
    %169 = arith.addf %155, %168 : vector<2x256xf32>
    %170 = vector.broadcast %11 : f32 to vector<2x256xf32>
    %171 = arith.mulf %170, %160 : vector<2x256xf32>
    %172 = arith.addf %156, %171 : vector<2x256xf32>
    %173 = vector.broadcast %12 : f32 to vector<2x256xf32>
    %174 = arith.mulf %173, %160 : vector<2x256xf32>
    %175 = arith.addf %157, %174 : vector<2x256xf32>
    %176 = vector.broadcast %13 : f32 to vector<2x256xf32>
    %177 = arith.mulf %176, %160 : vector<2x256xf32>
    %178 = arith.addf %158, %177 : vector<2x256xf32>
    %179 = vector.broadcast %14 : f32 to vector<2x256xf32>
    %180 = arith.mulf %179, %160 : vector<2x256xf32>
    %181 = arith.addf %159, %180 : vector<2x256xf32>
    %c0_39 = arith.constant 0 : index
    %c96_40 = arith.constant 96 : index
    %182 = vector.load %arg4[%c0_39, %c96_40] : memref<2x512xf32, #tpu.memory_space<vmem>>, vector<2x256xf32>
    %183 = vector.broadcast %15 : f32 to vector<2x256xf32>
    %184 = arith.mulf %183, %182 : vector<2x256xf32>
    %185 = arith.addf %163, %184 : vector<2x256xf32>
    %186 = vector.broadcast %16 : f32 to vector<2x256xf32>
    %187 = arith.mulf %186, %182 : vector<2x256xf32>
    %188 = arith.addf %166, %187 : vector<2x256xf32>
    %189 = vector.broadcast %17 : f32 to vector<2x256xf32>
    %190 = arith.mulf %189, %182 : vector<2x256xf32>
    %191 = arith.addf %169, %190 : vector<2x256xf32>
    %192 = vector.broadcast %18 : f32 to vector<2x256xf32>
    %193 = arith.mulf %192, %182 : vector<2x256xf32>
    %194 = arith.addf %172, %193 : vector<2x256xf32>
    %195 = vector.broadcast %19 : f32 to vector<2x256xf32>
    %196 = arith.mulf %195, %182 : vector<2x256xf32>
    %197 = arith.addf %175, %196 : vector<2x256xf32>
    %198 = vector.broadcast %20 : f32 to vector<2x256xf32>
    %199 = arith.mulf %198, %182 : vector<2x256xf32>
    %200 = arith.addf %178, %199 : vector<2x256xf32>
    %201 = vector.broadcast %21 : f32 to vector<2x256xf32>
    %202 = arith.mulf %201, %182 : vector<2x256xf32>
    %203 = arith.addf %181, %202 : vector<2x256xf32>
    %c0_41 = arith.constant 0 : index
    %c112 = arith.constant 112 : index
    %204 = vector.load %arg4[%c0_41, %c112] : memref<2x512xf32, #tpu.memory_space<vmem>>, vector<2x256xf32>
    %205 = vector.broadcast %22 : f32 to vector<2x256xf32>
    %206 = arith.mulf %205, %204 : vector<2x256xf32>
    %207 = arith.addf %185, %206 : vector<2x256xf32>
    %208 = vector.broadcast %23 : f32 to vector<2x256xf32>
    %209 = arith.mulf %208, %204 : vector<2x256xf32>
    %210 = arith.addf %188, %209 : vector<2x256xf32>
    %211 = vector.broadcast %24 : f32 to vector<2x256xf32>
    %212 = arith.mulf %211, %204 : vector<2x256xf32>
    %213 = arith.addf %191, %212 : vector<2x256xf32>
    %214 = vector.broadcast %25 : f32 to vector<2x256xf32>
    %215 = arith.mulf %214, %204 : vector<2x256xf32>
    %216 = arith.addf %194, %215 : vector<2x256xf32>
    %217 = vector.broadcast %26 : f32 to vector<2x256xf32>
    %218 = arith.mulf %217, %204 : vector<2x256xf32>
    %219 = arith.addf %197, %218 : vector<2x256xf32>
    %220 = vector.broadcast %27 : f32 to vector<2x256xf32>
    %221 = arith.mulf %220, %204 : vector<2x256xf32>
    %222 = arith.addf %200, %221 : vector<2x256xf32>
    %223 = vector.broadcast %28 : f32 to vector<2x256xf32>
    %224 = arith.mulf %223, %204 : vector<2x256xf32>
    %225 = arith.addf %203, %224 : vector<2x256xf32>
    %c0_42 = arith.constant 0 : index
    %c128_43 = arith.constant 128 : index
    %226 = vector.load %arg4[%c0_42, %c128_43] : memref<2x512xf32, #tpu.memory_space<vmem>>, vector<2x256xf32>
    %227 = vector.broadcast %29 : f32 to vector<2x256xf32>
    %228 = arith.mulf %227, %226 : vector<2x256xf32>
    %229 = arith.addf %207, %228 : vector<2x256xf32>
    %230 = vector.broadcast %30 : f32 to vector<2x256xf32>
    %231 = arith.mulf %230, %226 : vector<2x256xf32>
    %232 = arith.addf %210, %231 : vector<2x256xf32>
    %233 = vector.broadcast %31 : f32 to vector<2x256xf32>
    %234 = arith.mulf %233, %226 : vector<2x256xf32>
    %235 = arith.addf %213, %234 : vector<2x256xf32>
    %236 = vector.broadcast %32 : f32 to vector<2x256xf32>
    %237 = arith.mulf %236, %226 : vector<2x256xf32>
    %238 = arith.addf %216, %237 : vector<2x256xf32>
    %239 = vector.broadcast %33 : f32 to vector<2x256xf32>
    %240 = arith.mulf %239, %226 : vector<2x256xf32>
    %241 = arith.addf %219, %240 : vector<2x256xf32>
    %242 = vector.broadcast %34 : f32 to vector<2x256xf32>
    %243 = arith.mulf %242, %226 : vector<2x256xf32>
    %244 = arith.addf %222, %243 : vector<2x256xf32>
    %245 = vector.broadcast %35 : f32 to vector<2x256xf32>
    %246 = arith.mulf %245, %226 : vector<2x256xf32>
    %247 = arith.addf %225, %246 : vector<2x256xf32>
    %c0_44 = arith.constant 0 : index
    %c144 = arith.constant 144 : index
    %248 = vector.load %arg4[%c0_44, %c144] : memref<2x512xf32, #tpu.memory_space<vmem>>, vector<2x256xf32>
    %249 = vector.broadcast %36 : f32 to vector<2x256xf32>
    %250 = arith.mulf %249, %248 : vector<2x256xf32>
    %251 = arith.addf %229, %250 : vector<2x256xf32>
    %252 = vector.broadcast %37 : f32 to vector<2x256xf32>
    %253 = arith.mulf %252, %248 : vector<2x256xf32>
    %254 = arith.addf %232, %253 : vector<2x256xf32>
    %255 = vector.broadcast %38 : f32 to vector<2x256xf32>
    %256 = arith.mulf %255, %248 : vector<2x256xf32>
    %257 = arith.addf %235, %256 : vector<2x256xf32>
    %258 = vector.broadcast %39 : f32 to vector<2x256xf32>
    %259 = arith.mulf %258, %248 : vector<2x256xf32>
    %260 = arith.addf %238, %259 : vector<2x256xf32>
    %261 = vector.broadcast %40 : f32 to vector<2x256xf32>
    %262 = arith.mulf %261, %248 : vector<2x256xf32>
    %263 = arith.addf %241, %262 : vector<2x256xf32>
    %264 = vector.broadcast %41 : f32 to vector<2x256xf32>
    %265 = arith.mulf %264, %248 : vector<2x256xf32>
    %266 = arith.addf %244, %265 : vector<2x256xf32>
    %267 = vector.broadcast %42 : f32 to vector<2x256xf32>
    %268 = arith.mulf %267, %248 : vector<2x256xf32>
    %269 = arith.addf %247, %268 : vector<2x256xf32>
    %c0_45 = arith.constant 0 : index
    %c160 = arith.constant 160 : index
    %270 = vector.load %arg4[%c0_45, %c160] : memref<2x512xf32, #tpu.memory_space<vmem>>, vector<2x256xf32>
    %271 = vector.broadcast %43 : f32 to vector<2x256xf32>
    %272 = arith.mulf %271, %270 : vector<2x256xf32>
    %273 = arith.addf %251, %272 : vector<2x256xf32>
    %274 = vector.broadcast %44 : f32 to vector<2x256xf32>
    %275 = arith.mulf %274, %270 : vector<2x256xf32>
    %276 = arith.addf %254, %275 : vector<2x256xf32>
    %277 = vector.broadcast %45 : f32 to vector<2x256xf32>
    %278 = arith.mulf %277, %270 : vector<2x256xf32>
    %279 = arith.addf %257, %278 : vector<2x256xf32>
    %280 = vector.broadcast %46 : f32 to vector<2x256xf32>
    %281 = arith.mulf %280, %270 : vector<2x256xf32>
    %282 = arith.addf %260, %281 : vector<2x256xf32>
    %283 = vector.broadcast %47 : f32 to vector<2x256xf32>
    %284 = arith.mulf %283, %270 : vector<2x256xf32>
    %285 = arith.addf %263, %284 : vector<2x256xf32>
    %286 = vector.broadcast %48 : f32 to vector<2x256xf32>
    %287 = arith.mulf %286, %270 : vector<2x256xf32>
    %288 = arith.addf %266, %287 : vector<2x256xf32>
    %289 = vector.broadcast %49 : f32 to vector<2x256xf32>
    %290 = arith.mulf %289, %270 : vector<2x256xf32>
    %291 = arith.addf %269, %290 : vector<2x256xf32>
    %c0_46 = arith.constant 0 : index
    %c176 = arith.constant 176 : index
    %292 = vector.load %arg4[%c0_46, %c176] : memref<2x512xf32, #tpu.memory_space<vmem>>, vector<2x256xf32>
    %293 = vector.broadcast %50 : f32 to vector<2x256xf32>
    %294 = arith.mulf %293, %292 : vector<2x256xf32>
    %295 = arith.addf %273, %294 : vector<2x256xf32>
    %296 = vector.broadcast %51 : f32 to vector<2x256xf32>
    %297 = arith.mulf %296, %292 : vector<2x256xf32>
    %298 = arith.addf %276, %297 : vector<2x256xf32>
    %299 = vector.broadcast %52 : f32 to vector<2x256xf32>
    %300 = arith.mulf %299, %292 : vector<2x256xf32>
    %301 = arith.addf %279, %300 : vector<2x256xf32>
    %302 = vector.broadcast %53 : f32 to vector<2x256xf32>
    %303 = arith.mulf %302, %292 : vector<2x256xf32>
    %304 = arith.addf %282, %303 : vector<2x256xf32>
    %305 = vector.broadcast %54 : f32 to vector<2x256xf32>
    %306 = arith.mulf %305, %292 : vector<2x256xf32>
    %307 = arith.addf %285, %306 : vector<2x256xf32>
    %308 = vector.broadcast %55 : f32 to vector<2x256xf32>
    %309 = arith.mulf %308, %292 : vector<2x256xf32>
    %310 = arith.addf %288, %309 : vector<2x256xf32>
    %311 = vector.broadcast %56 : f32 to vector<2x256xf32>
    %312 = arith.mulf %311, %292 : vector<2x256xf32>
    %313 = arith.addf %291, %312 : vector<2x256xf32>
    %c0_47 = arith.constant 0 : index
    %c80_48 = arith.constant 80 : index
    %314 = vector.load %arg5[%c0_47, %c80_48] : memref<2x512xf32, #tpu.memory_space<vmem>>, vector<2x256xf32>
    %315 = vector.broadcast %57 : f32 to vector<2x256xf32>
    %316 = arith.mulf %315, %314 : vector<2x256xf32>
    %317 = arith.addf %295, %316 : vector<2x256xf32>
    %318 = vector.broadcast %58 : f32 to vector<2x256xf32>
    %319 = arith.mulf %318, %314 : vector<2x256xf32>
    %320 = arith.addf %298, %319 : vector<2x256xf32>
    %321 = vector.broadcast %59 : f32 to vector<2x256xf32>
    %322 = arith.mulf %321, %314 : vector<2x256xf32>
    %323 = arith.addf %301, %322 : vector<2x256xf32>
    %324 = vector.broadcast %60 : f32 to vector<2x256xf32>
    %325 = arith.mulf %324, %314 : vector<2x256xf32>
    %326 = arith.addf %304, %325 : vector<2x256xf32>
    %327 = vector.broadcast %61 : f32 to vector<2x256xf32>
    %328 = arith.mulf %327, %314 : vector<2x256xf32>
    %329 = arith.addf %307, %328 : vector<2x256xf32>
    %330 = vector.broadcast %62 : f32 to vector<2x256xf32>
    %331 = arith.mulf %330, %314 : vector<2x256xf32>
    %332 = arith.addf %310, %331 : vector<2x256xf32>
    %333 = vector.broadcast %63 : f32 to vector<2x256xf32>
    %334 = arith.mulf %333, %314 : vector<2x256xf32>
    %335 = arith.addf %313, %334 : vector<2x256xf32>
    %c0_49 = arith.constant 0 : index
    %c96_50 = arith.constant 96 : index
    %336 = vector.load %arg5[%c0_49, %c96_50] : memref<2x512xf32, #tpu.memory_space<vmem>>, vector<2x256xf32>
    %337 = vector.broadcast %64 : f32 to vector<2x256xf32>
    %338 = arith.mulf %337, %336 : vector<2x256xf32>
    %339 = arith.addf %317, %338 : vector<2x256xf32>
    %340 = vector.broadcast %65 : f32 to vector<2x256xf32>
    %341 = arith.mulf %340, %336 : vector<2x256xf32>
    %342 = arith.addf %320, %341 : vector<2x256xf32>
    %343 = vector.broadcast %66 : f32 to vector<2x256xf32>
    %344 = arith.mulf %343, %336 : vector<2x256xf32>
    %345 = arith.addf %323, %344 : vector<2x256xf32>
    %346 = vector.broadcast %67 : f32 to vector<2x256xf32>
    %347 = arith.mulf %346, %336 : vector<2x256xf32>
    %348 = arith.addf %326, %347 : vector<2x256xf32>
    %349 = vector.broadcast %68 : f32 to vector<2x256xf32>
    %350 = arith.mulf %349, %336 : vector<2x256xf32>
    %351 = arith.addf %329, %350 : vector<2x256xf32>
    %352 = vector.broadcast %69 : f32 to vector<2x256xf32>
    %353 = arith.mulf %352, %336 : vector<2x256xf32>
    %354 = arith.addf %332, %353 : vector<2x256xf32>
    %355 = vector.broadcast %70 : f32 to vector<2x256xf32>
    %356 = arith.mulf %355, %336 : vector<2x256xf32>
    %357 = arith.addf %335, %356 : vector<2x256xf32>
    %c0_51 = arith.constant 0 : index
    %c112_52 = arith.constant 112 : index
    %358 = vector.load %arg5[%c0_51, %c112_52] : memref<2x512xf32, #tpu.memory_space<vmem>>, vector<2x256xf32>
    %359 = vector.broadcast %71 : f32 to vector<2x256xf32>
    %360 = arith.mulf %359, %358 : vector<2x256xf32>
    %361 = arith.addf %339, %360 : vector<2x256xf32>
    %362 = vector.broadcast %72 : f32 to vector<2x256xf32>
    %363 = arith.mulf %362, %358 : vector<2x256xf32>
    %364 = arith.addf %342, %363 : vector<2x256xf32>
    %365 = vector.broadcast %73 : f32 to vector<2x256xf32>
    %366 = arith.mulf %365, %358 : vector<2x256xf32>
    %367 = arith.addf %345, %366 : vector<2x256xf32>
    %368 = vector.broadcast %74 : f32 to vector<2x256xf32>
    %369 = arith.mulf %368, %358 : vector<2x256xf32>
    %370 = arith.addf %348, %369 : vector<2x256xf32>
    %371 = vector.broadcast %75 : f32 to vector<2x256xf32>
    %372 = arith.mulf %371, %358 : vector<2x256xf32>
    %373 = arith.addf %351, %372 : vector<2x256xf32>
    %374 = vector.broadcast %76 : f32 to vector<2x256xf32>
    %375 = arith.mulf %374, %358 : vector<2x256xf32>
    %376 = arith.addf %354, %375 : vector<2x256xf32>
    %377 = vector.broadcast %77 : f32 to vector<2x256xf32>
    %378 = arith.mulf %377, %358 : vector<2x256xf32>
    %379 = arith.addf %357, %378 : vector<2x256xf32>
    %c0_53 = arith.constant 0 : index
    %c128_54 = arith.constant 128 : index
    %380 = vector.load %arg5[%c0_53, %c128_54] : memref<2x512xf32, #tpu.memory_space<vmem>>, vector<2x256xf32>
    %381 = vector.broadcast %78 : f32 to vector<2x256xf32>
    %382 = arith.mulf %381, %380 : vector<2x256xf32>
    %383 = arith.addf %361, %382 : vector<2x256xf32>
    %384 = vector.broadcast %79 : f32 to vector<2x256xf32>
    %385 = arith.mulf %384, %380 : vector<2x256xf32>
    %386 = arith.addf %364, %385 : vector<2x256xf32>
    %387 = vector.broadcast %80 : f32 to vector<2x256xf32>
    %388 = arith.mulf %387, %380 : vector<2x256xf32>
    %389 = arith.addf %367, %388 : vector<2x256xf32>
    %390 = vector.broadcast %81 : f32 to vector<2x256xf32>
    %391 = arith.mulf %390, %380 : vector<2x256xf32>
    %392 = arith.addf %370, %391 : vector<2x256xf32>
    %393 = vector.broadcast %82 : f32 to vector<2x256xf32>
    %394 = arith.mulf %393, %380 : vector<2x256xf32>
    %395 = arith.addf %373, %394 : vector<2x256xf32>
    %396 = vector.broadcast %83 : f32 to vector<2x256xf32>
    %397 = arith.mulf %396, %380 : vector<2x256xf32>
    %398 = arith.addf %376, %397 : vector<2x256xf32>
    %399 = vector.broadcast %84 : f32 to vector<2x256xf32>
    %400 = arith.mulf %399, %380 : vector<2x256xf32>
    %401 = arith.addf %379, %400 : vector<2x256xf32>
    %c0_55 = arith.constant 0 : index
    %c144_56 = arith.constant 144 : index
    %402 = vector.load %arg5[%c0_55, %c144_56] : memref<2x512xf32, #tpu.memory_space<vmem>>, vector<2x256xf32>
    %403 = vector.broadcast %85 : f32 to vector<2x256xf32>
    %404 = arith.mulf %403, %402 : vector<2x256xf32>
    %405 = arith.addf %383, %404 : vector<2x256xf32>
    %406 = vector.broadcast %86 : f32 to vector<2x256xf32>
    %407 = arith.mulf %406, %402 : vector<2x256xf32>
    %408 = arith.addf %386, %407 : vector<2x256xf32>
    %409 = vector.broadcast %87 : f32 to vector<2x256xf32>
    %410 = arith.mulf %409, %402 : vector<2x256xf32>
    %411 = arith.addf %389, %410 : vector<2x256xf32>
    %412 = vector.broadcast %88 : f32 to vector<2x256xf32>
    %413 = arith.mulf %412, %402 : vector<2x256xf32>
    %414 = arith.addf %392, %413 : vector<2x256xf32>
    %415 = vector.broadcast %89 : f32 to vector<2x256xf32>
    %416 = arith.mulf %415, %402 : vector<2x256xf32>
    %417 = arith.addf %395, %416 : vector<2x256xf32>
    %418 = vector.broadcast %90 : f32 to vector<2x256xf32>
    %419 = arith.mulf %418, %402 : vector<2x256xf32>
    %420 = arith.addf %398, %419 : vector<2x256xf32>
    %421 = vector.broadcast %91 : f32 to vector<2x256xf32>
    %422 = arith.mulf %421, %402 : vector<2x256xf32>
    %423 = arith.addf %401, %422 : vector<2x256xf32>
    %c0_57 = arith.constant 0 : index
    %c160_58 = arith.constant 160 : index
    %424 = vector.load %arg5[%c0_57, %c160_58] : memref<2x512xf32, #tpu.memory_space<vmem>>, vector<2x256xf32>
    %425 = vector.broadcast %92 : f32 to vector<2x256xf32>
    %426 = arith.mulf %425, %424 : vector<2x256xf32>
    %427 = arith.addf %405, %426 : vector<2x256xf32>
    %428 = vector.broadcast %93 : f32 to vector<2x256xf32>
    %429 = arith.mulf %428, %424 : vector<2x256xf32>
    %430 = arith.addf %408, %429 : vector<2x256xf32>
    %431 = vector.broadcast %94 : f32 to vector<2x256xf32>
    %432 = arith.mulf %431, %424 : vector<2x256xf32>
    %433 = arith.addf %411, %432 : vector<2x256xf32>
    %434 = vector.broadcast %95 : f32 to vector<2x256xf32>
    %435 = arith.mulf %434, %424 : vector<2x256xf32>
    %436 = arith.addf %414, %435 : vector<2x256xf32>
    %437 = vector.broadcast %96 : f32 to vector<2x256xf32>
    %438 = arith.mulf %437, %424 : vector<2x256xf32>
    %439 = arith.addf %417, %438 : vector<2x256xf32>
    %440 = vector.broadcast %97 : f32 to vector<2x256xf32>
    %441 = arith.mulf %440, %424 : vector<2x256xf32>
    %442 = arith.addf %420, %441 : vector<2x256xf32>
    %443 = vector.broadcast %98 : f32 to vector<2x256xf32>
    %444 = arith.mulf %443, %424 : vector<2x256xf32>
    %445 = arith.addf %423, %444 : vector<2x256xf32>
    %c0_59 = arith.constant 0 : index
    %c176_60 = arith.constant 176 : index
    %446 = vector.load %arg5[%c0_59, %c176_60] : memref<2x512xf32, #tpu.memory_space<vmem>>, vector<2x256xf32>
    %447 = vector.broadcast %99 : f32 to vector<2x256xf32>
    %448 = arith.mulf %447, %446 : vector<2x256xf32>
    %449 = arith.addf %427, %448 : vector<2x256xf32>
    %450 = vector.broadcast %100 : f32 to vector<2x256xf32>
    %451 = arith.mulf %450, %446 : vector<2x256xf32>
    %452 = arith.addf %430, %451 : vector<2x256xf32>
    %453 = vector.broadcast %101 : f32 to vector<2x256xf32>
    %454 = arith.mulf %453, %446 : vector<2x256xf32>
    %455 = arith.addf %433, %454 : vector<2x256xf32>
    %456 = vector.broadcast %102 : f32 to vector<2x256xf32>
    %457 = arith.mulf %456, %446 : vector<2x256xf32>
    %458 = arith.addf %436, %457 : vector<2x256xf32>
    %459 = vector.broadcast %103 : f32 to vector<2x256xf32>
    %460 = arith.mulf %459, %446 : vector<2x256xf32>
    %461 = arith.addf %439, %460 : vector<2x256xf32>
    %462 = vector.broadcast %104 : f32 to vector<2x256xf32>
    %463 = arith.mulf %462, %446 : vector<2x256xf32>
    %464 = arith.addf %442, %463 : vector<2x256xf32>
    %465 = vector.broadcast %105 : f32 to vector<2x256xf32>
    %466 = arith.mulf %465, %446 : vector<2x256xf32>
    %467 = arith.addf %445, %466 : vector<2x256xf32>
    %c3_i32_61 = arith.constant 3 : i32
    %468 = tpu.dynamic_rotate %449 by %c3_i32_61 dim 1 : vector<2x256xf32>, i32 -> vector<2x256xf32>
    %cst_62 = arith.constant 0.000000e+00 : f32
    %469 = vector.shape_cast %124 : vector<1x256xi1> to vector<1x256xi1>
    %470 = vector.broadcast %469 : vector<1x256xi1> to vector<2x256xi1>
    %471 = vector.broadcast %cst_62 : f32 to vector<2x256xf32>
    %472 = arith.select %470, %468, %471 : vector<2x256xi1>, vector<2x256xf32>
    %c2_i32_63 = arith.constant 2 : i32
    %473 = tpu.dynamic_rotate %452 by %c2_i32_63 dim 1 : vector<2x256xf32>, i32 -> vector<2x256xf32>
    %cst_64 = arith.constant 0.000000e+00 : f32
    %474 = vector.shape_cast %126 : vector<1x256xi1> to vector<1x256xi1>
    %475 = vector.broadcast %474 : vector<1x256xi1> to vector<2x256xi1>
    %476 = vector.broadcast %cst_64 : f32 to vector<2x256xf32>
    %477 = arith.select %475, %473, %476 : vector<2x256xi1>, vector<2x256xf32>
    %478 = arith.addf %472, %477 : vector<2x256xf32>
    %c1_i32_65 = arith.constant 1 : i32
    %479 = tpu.dynamic_rotate %455 by %c1_i32_65 dim 1 : vector<2x256xf32>, i32 -> vector<2x256xf32>
    %cst_66 = arith.constant 0.000000e+00 : f32
    %480 = vector.shape_cast %128 : vector<1x256xi1> to vector<1x256xi1>
    %481 = vector.broadcast %480 : vector<1x256xi1> to vector<2x256xi1>
    %482 = vector.broadcast %cst_66 : f32 to vector<2x256xf32>
    %483 = arith.select %481, %479, %482 : vector<2x256xi1>, vector<2x256xf32>
    %484 = arith.addf %478, %483 : vector<2x256xf32>
    %485 = arith.addf %484, %458 : vector<2x256xf32>
    %c255_i32 = arith.constant 255 : i32
    %486 = tpu.dynamic_rotate %461 by %c255_i32 dim 1 : vector<2x256xf32>, i32 -> vector<2x256xf32>
    %cst_67 = arith.constant 0.000000e+00 : f32
    %487 = vector.shape_cast %130 : vector<1x256xi1> to vector<1x256xi1>
    %488 = vector.broadcast %487 : vector<1x256xi1> to vector<2x256xi1>
    %489 = vector.broadcast %cst_67 : f32 to vector<2x256xf32>
    %490 = arith.select %488, %486, %489 : vector<2x256xi1>, vector<2x256xf32>
    %491 = arith.addf %485, %490 : vector<2x256xf32>
    %c254_i32 = arith.constant 254 : i32
    %492 = tpu.dynamic_rotate %464 by %c254_i32 dim 1 : vector<2x256xf32>, i32 -> vector<2x256xf32>
    %cst_68 = arith.constant 0.000000e+00 : f32
    %493 = vector.shape_cast %132 : vector<1x256xi1> to vector<1x256xi1>
    %494 = vector.broadcast %493 : vector<1x256xi1> to vector<2x256xi1>
    %495 = vector.broadcast %cst_68 : f32 to vector<2x256xf32>
    %496 = arith.select %494, %492, %495 : vector<2x256xi1>, vector<2x256xf32>
    %497 = arith.addf %491, %496 : vector<2x256xf32>
    %c253_i32 = arith.constant 253 : i32
    %498 = tpu.dynamic_rotate %467 by %c253_i32 dim 1 : vector<2x256xf32>, i32 -> vector<2x256xf32>
    %cst_69 = arith.constant 0.000000e+00 : f32
    %499 = vector.shape_cast %134 : vector<1x256xi1> to vector<1x256xi1>
    %500 = vector.broadcast %499 : vector<1x256xi1> to vector<2x256xi1>
    %501 = vector.broadcast %cst_69 : f32 to vector<2x256xf32>
    %502 = arith.select %500, %498, %501 : vector<2x256xi1>, vector<2x256xf32>
    %503 = arith.addf %497, %502 : vector<2x256xf32>
    %cst_70 = arith.constant 5.000000e-01 : f32
    %504 = vector.broadcast %cst_70 : f32 to vector<2x256xf32>
    %505 = arith.mulf %504, %503 : vector<2x256xf32>
    %506 = math.tanh %505 : vector<2x256xf32>
    %cst_71 = arith.constant 5.000000e-01 : f32
    %507 = vector.broadcast %cst_71 : f32 to vector<2x256xf32>
    %508 = arith.mulf %507, %506 : vector<2x256xf32>
    %cst_72 = arith.constant 5.000000e-01 : f32
    %509 = vector.broadcast %cst_72 : f32 to vector<2x256xf32>
    %510 = arith.addf %508, %509 : vector<2x256xf32>
    %c0_73 = arith.constant 0 : index
    %c0_74 = arith.constant 0 : index
    %c0_75 = arith.constant 0 : index
    %511 = vector.load %arg1[%c0_73, %c0_74, %c0_75] : memref<2x4x256xf32, #tpu.memory_space<vmem>>, vector<2x4x256xf32>
    %512 = vector.shape_cast %510 : vector<2x256xf32> to vector<2x1x256xf32>
    %513 = vector.broadcast %512 : vector<2x1x256xf32> to vector<2x4x256xf32>
    %514 = arith.mulf %511, %513 : vector<2x4x256xf32>
    %c0_76 = arith.constant 0 : index
    %c0_77 = arith.constant 0 : index
    %c0_78 = arith.constant 0 : index
    %515 = vector.load %arg3[%c0_76, %c0_77, %c0_78] : memref<2x4x256xf32, #tpu.memory_space<vmem>>, vector<2x4x256xf32>
    tpu.vector_store %arg3[%c0_76, %c0_77, %c0_78], %514 {strides = array<i32>} : memref<2x4x256xf32, #tpu.memory_space<vmem>>, vector<2x4x256xf32>,
    return
  }
  func.func @transform_0(%arg0: i32) -> (i32, i32, i32) {
    %c0_i32 = arith.constant 0 : i32
    %c0_i32_0 = arith.constant 0 : i32
    %c0_i32_1 = arith.constant 0 : i32
    return %arg0, %c0_i32, %c0_i32_0 : i32, i32, i32
  }
  func.func @transform_1(%arg0: i32) -> i32 {
    %c0_i32 = arith.constant 0 : i32
    %c0_i32_0 = arith.constant 0 : i32
    return %c0_i32 : i32
  }
  func.func @transform_2(%arg0: i32) -> (i32, i32, i32) {
    %c0_i32 = arith.constant 0 : i32
    %c0_i32_0 = arith.constant 0 : i32
    %c0_i32_1 = arith.constant 0 : i32
    return %arg0, %c0_i32, %c0_i32_0 : i32, i32, i32
  }
}

</mosaic_0001>

<bundles_post_ra>
// kernel: tpu_custom_call.1
= control target key start
LH: loop header
LB: loop body
LE: loop exit
PB: predicated region body
PF: predicated region fallthrough
CT: control target
= control target key end

     0   :  { %7 = vsyncpa [#allocation5], 0  ;;  %s2256_s0 = inlined_call_operand.hbm [shape: f32[2,4,256], index: 0, kind: input, shape index: {}]   ;;  %s2257_s1 = inlined_call_operand.vmem [shape: f32[98], index: 1, kind: input, shape index: {}]   ;;  %s2258_s2 = inlined_call_operand.hbm [shape: f32[2,4,256], index: 2, kind: output, shape index: {}]  }
   0x1   :  { %8 = vsyncpa [#allocation7], 0 }
   0x2   :  { %9 = vsyncpa [#allocation6], 0  ;;  %s1586_s9 = smov [#allocation4]   ;;  %s28_s13 = sshll.u32 %s2257_s1, 4  ;;  %s29_s13 = int_to_ptr.vmem [resolvable:$true] %s28_s13 }
   0x3   :  { %s15_s10 = sshll.u32 %s1586_s9, 4  ;;  %s1524_s16 = scalar_lea.hbm %s2256_s0, 256  ;;  %s16_s10 = int_to_ptr.vmem [resolvable:$true] %s15_s10 }
   0x4   :  { %p1525_p0 = scmp.ne.s32.totalorder %s2256_s0, %s1524_s16  ;;  %p1528_p1 = scmp.lt.u32.totalorder %s1524_s16, %s2256_s0 }
   0x6   :  { %p1530_p2 = pnand %p1528_p1, %p1525_p0 }
   0x8   :  { %1533 = shalt.err (!%p1530_p2)
}
   0x9   :  { %s1534_s21 = scalar_lea.vmem %s16_s10, 256  ;;  %p1539_p4 = scmp.lt.s32.totalorder %s16_s10, %s16_s10 }
   0xa   :  { %p1535_p3 = scmp.ne.s32.totalorder %s16_s10, %s1534_s21  ;;  %p1540_p5 = scmp.lt.s32.totalorder %s1534_s21, %s1534_s21 }
   0xc   :  { %p1541_p6 = por %p1540_p5, %p1539_p4 }
   0xe   :  { %p1542_p7 = pnand %p1541_p6, %p1535_p3 }
  0x10   :  { %1545 = shalt.err (!%p1542_p7)
}
  0x11   :  { %s1587_s1 = smov 128   ;;  %s1588_s22 = smov 8  }
  0x12   :  { %21 = dma.hbm_to_vmem [thread:$0]  %s2256_s0, 256, %s16_s10, [#allocation5], %s1587_s1, %s1587_s1, %s1588_s22  }
  0x13   :  { %s1546_s25 = scalar_lea.vmem %s29_s13, 16  ;;  %p1551_p9 = scmp.lt.s32.totalorder %s29_s13, %s29_s13 }
  0x14   :  { %p1547_p8 = scmp.ne.s32.totalorder %s29_s13, %s1546_s25  ;;  %p1552_p10 = scmp.lt.s32.totalorder %s1546_s25, %s1546_s25 }
  0x16   :  { %p1553_p11 = por %p1552_p10, %p1551_p9 }
  0x18   :  { %p1554_p12 = pnand %p1553_p11, %p1547_p8 }
  0x1a   :  { %1557 = shalt.err (!%p1554_p12)
}
  0x1b   :  { %s1589_s26 = smov [#allocation8]  }
  0x1c   :  { %31 = dma.vmem_to_smem %s29_s13, 16, %s1589_s26, [#allocation7]  }
  0x1d   :  { %1580 = dma.done.wait [#allocation5], 256  }
  0x1e   :  { %1581 = vsyncadd [#allocation5], 4294967040 }
  0x1f   :  { %1582 = dma.done.wait [#allocation7], 16  }
  0x20   :  { %1583 = vsyncadd [#allocation7], 4294967280 }
  0x21   :  { %38 = sfence }
  0x22   :  { %v180_v0 = vld [vmem:[#allocation4] ss:$4 sm:$0x3]  ;;  %v1590_v1 = vmov 0.0   ;;  %s1407_s0 = sld [smem:[#allocation8 + $0x9]]  ;;  %s1405_s27 = sld [smem:[#allocation8 + $0x7]] }
  0x23   :  { %39 = vst [vmem:[#allocation2] sm:$0x3] %v1590_v1  ;;  %v182_v2 = vld [vmem:[#allocation4 + $0x8] ss:$4 sm:$0x3]  ;;  %s1412_s28 = sld [smem:[#allocation8 + $0xe]] }
  0x24   :  { %v184_v3 = vld [vmem:[#allocation4 + $0x1] ss:$4 sm:$0x3]  ;;  %40 = vst [vmem:[#allocation3] sm:$0x3] %v1590_v1  ;;  %s1406_s29 = sld [smem:[#allocation8 + $0x8]] }
  0x25   :  { %41 = vst [vmem:[#allocation2 + $0x6] sm:$0x3] %v1590_v1  ;;  %42 = vst [vmem:[#allocation3 + $0x6] sm:$0x3] %v1590_v1  ;;  %v187_v5 = vadd.f32 %v184_v3, %v180_v0  ;;  %v189_v7 = vmax.f32 %v180_v0, %v184_v3  ;;  %s1414_s30 = sld [smem:[#allocation8 + $0x10]]  ;;  %s1413_s3 = sld [smem:[#allocation8 + $0xf]] }
  0x26   :  { %v186_v4 = vld [vmem:[#allocation4 + $0x9] ss:$4 sm:$0x3]  ;;  %v192_v6 = vld [vmem:[#allocation4 + $0x2] ss:$4 sm:$0x3] }
  0x27   :  { %v188_v8 = vadd.f32 %v186_v4, %v182_v2  ;;  %v194_v9 = vld [vmem:[#allocation4 + $0xa] ss:$4 sm:$0x3]  ;;  %v200_v10 = vld [vmem:[#allocation4 + $0x3] ss:$4 sm:$0x3]  ;;  %v190_v11 = vmax.f32 %v182_v2, %v186_v4  ;;  %v195_v12 = vadd.f32 %v192_v6, %v187_v5  ;;  %v197_v14 = vmax.f32 %v189_v7, %v192_v6 }
  0x28   :  { %v202_v13 = vld [vmem:[#allocation4 + $0xb] ss:$4 sm:$0x3]  ;;  %v274_v25 = vstv %s1407_s0  ;;  %v255_v26 = vstv %s1405_s27  ;;  %s1420_s4 = sld [smem:[#allocation8 + $0x16]]  ;;  %s1419_s5 = sld [smem:[#allocation8 + $0x15]]  ;;  %vm261_vm0 = vcmask 916480  }
  0x29   :  { %v196_v15 = vadd.f32 %v194_v9, %v188_v8  ;;  %v198_v16 = vmax.f32 %v190_v11, %v194_v9  ;;  %v203_v17 = vadd.f32 %v200_v10, %v195_v12  ;;  %v205_v18 = vmax.f32 %v197_v14, %v200_v10  ;;  %s1591_s6 = smov 112   ;;  %s1421_s7 = sld [smem:[#allocation8 + $0x17]] }
  0x2a   :  { %v319_v28 = vstv %s1412_s28  ;;  %v265_v29 = vstv %s1406_s29  ;;  %s1409_s8 = sld [smem:[#allocation8 + $0xb]]  ;;  %s1592_s9 = smov 96   ;;  %vm325_vm1 = vcmask 785408   ;;  %vm390_vm2 = vcmask 654336  }
  0x2b   :  { %v204_v19 = vadd.f32 %v202_v13, %v196_v15  ;;  %v206_v20 = vmax.f32 %v198_v16, %v202_v13  ;;  %v207_v21 = vmul.f32 0.25, %v203_v17  ;;  %v338_v34 = vstv %s1414_s30  ;;  %s1427_s10 = sld [smem:[#allocation8 + $0x1d]]  ;;  %s1426_s11 = sld [smem:[#allocation8 + $0x1c]] }
  0x2c   :  { %v329_v35 = vstv %s1413_s3  ;;  %s1416_s12 = sld [smem:[#allocation8 + $0x12]]  ;;  %s1410_s13 = sld [smem:[#allocation8 + $0xc]]  ;;  %vm455_vm3 = vcmask 523264   ;;  %vm519_vm4 = vcmask 392192   ;;  %vm583_vm5 = vcmask 261120  }
  0x2d   :  { %v208_v22 = vmul.f32 0.25, %v204_v19  ;;  %v223_v23 = vcombine.low %v205_v18, %v206_v20  ;;  %s1593_s14 = smov 80   ;;  %s1433_s15 = sld [smem:[#allocation8 + $0x23]] }
  0x2e   :  { %v394_v39 = vstv %s1420_s4  ;;  %v384_v40 = vstv %s1419_s5  ;;  %s1428_s16 = sld [smem:[#allocation8 + $0x1e]]  ;;  %s1411_s17 = sld [smem:[#allocation8 + $0xd]] }
  0x2f   :  { %v211_v24 = vcombine.low %v207_v21, %v208_v22  ;;  %1497 = vst.sshfl [vmem:[#allocation3 + $0x2] sm:$0x33 pattern:$0x75316420] %v223_v23  ;;  %v403_v43 = vstv %s1421_s7  ;;  %s1434_s18 = sld [smem:[#allocation8 + $0x24]]  ;;  %s1594_s19 = smov 64  }
  0x30   :  { %v292_v44 = vstv %s1409_s8  ;;  %s1423_s20 = sld [smem:[#allocation8 + $0x19]]  ;;  %s1417_s21 = sld [smem:[#allocation8 + $0x13]] }
  0x31   :  { %1496 = vst.sshfl [vmem:[#allocation2 + $0x2] sm:$0x33 pattern:$0x75316420] %v211_v24  ;;  %v459_v48 = vstv %s1427_s10  ;;  %v449_v49 = vstv %s1426_s11  ;;  %s1440_s23 = sld [smem:[#allocation8 + $0x2a]]  ;;  %s1435_s24 = sld [smem:[#allocation8 + $0x25]] }
  0x32   :  { %v356_v52 = vstv %s1416_s12  ;;  %v301_v53 = vstv %s1410_s13  ;;  %s1595_s25 = smov 48   ;;  %s1418_s26 = sld [smem:[#allocation8 + $0x14]] }
  0x33   :  { %v513_v56 = vstv %s1433_s15  ;;  %s1441_s0 = sld [smem:[#allocation8 + $0x2b]]  ;;  %s1430_s27 = sld [smem:[#allocation8 + $0x20]] }
  0x34   :  { %v468_v57 = vstv %s1428_s16  ;;  %v310_v60 = vstv %s1411_s17  ;;  %s1424_s28 = sld [smem:[#allocation8 + $0x1a]]  ;;  %s1425_s29 = sld [smem:[#allocation8 + $0x1b]] }
  0x35   :  { %v523_v61 = vstv %s1434_s18  ;;  %s1442_s30 = sld [smem:[#allocation8 + $0x2c]]  ;;  %s1596_s3 = smov 32  }
  0x36   :  { %v421_v0 = vstv %s1423_s20  ;;  %v365_v1 = vstv %s1417_s21  ;;  %s1437_s4 = sld [smem:[#allocation8 + $0x27]]  ;;  %s1431_s5 = sld [smem:[#allocation8 + $0x21]]  ;;  %v1703_v24 = vld [vmem:[#allocation3] sm:$0x3f] }
  0x37   :  { %v577_v4 = vstv %s1440_s23  ;;  %v532_v5 = vstv %s1435_s24  ;;  %s1455_s7 = sld [smem:[#allocation8 + $0x39]]  ;;  %s1454_s8 = sld [smem:[#allocation8 + $0x38]] }
  0x38   :  { %v1639_v27 = vld [vmem:[#allocation2] sm:$0x3f]  ;;  %v374_v8 = vstv %s1418_s26  ;;  %s1438_s10 = sld [smem:[#allocation8 + $0x28]]  ;;  %s1432_s11 = sld [smem:[#allocation8 + $0x22]] }
  0x39   :  { %v275_v30 = vmul.f32 %v274_v25, %v1639_v27  ;;  %v256_v31 = vmul.f32 %v255_v26, %v1639_v27  ;;  %v320_v32 = vmul.f32 %v319_v28, %v1639_v27  ;;  %v266_v33 = vmul.f32 %v265_v29, %v1639_v27  ;;  %v1651_v38 = vld [vmem:[#allocation2 + $0x2] sm:$0xf]  ;;  %s1456_s12 = sld [smem:[#allocation8 + $0x3a]]  ;;  %s1444_s13 = sld [smem:[#allocation8 + $0x2e]] }
  0x3a   :  { %v339_v36 = vmul.f32 %v338_v34, %v1639_v27  ;;  %v330_v37 = vmul.f32 %v329_v35, %v1639_v27  ;;  %v395_v41 = vmul.f32 %v394_v39, %v1651_v38  ;;  %v385_v42 = vmul.f32 %v384_v40, %v1651_v38  ;;  %v1661_v47 = vld [vmem:[#allocation2 + $0x2] sm:$0x3f]  ;;  %s1462_s15 = sld [smem:[#allocation8 + $0x40]]  ;;  %s1461_s16 = sld [smem:[#allocation8 + $0x3f]] }
  0x3b   :  { %277 = vrot.lane.b32.xlu1 %v275_v30, %s1591_s6  ;;  %258 = vrot.lane.b32.xlu0 %v256_v31, %s1591_s6  ;;  %v404_v45 = vmul.f32 %v403_v43, %v1651_v38  ;;  %v293_v46 = vmul.f32 %v292_v44, %v1639_v27  ;;  %v460_v50 = vmul.f32 %v459_v48, %v1661_v47  ;;  %v587_v9 = vstv %s1441_s0  ;;  %s1445_s17 = sld [smem:[#allocation8 + $0x2f]]  ;;  %s1439_s18 = sld [smem:[#allocation8 + $0x29]]  ;;  %v1725_v48 = vld [vmem:[#allocation3 + $0x2] sm:$0xf] }
  0x3c   :  { %v450_v51 = vmul.f32 %v449_v49, %v1661_v47  ;;  %v357_v54 = vmul.f32 %v356_v52, %v1639_v27  ;;  %v302_v55 = vmul.f32 %v301_v53, %v1639_v27  ;;  %v514_v58 = vmul.f32 %v513_v56, %v1661_v47  ;;  %s1468_s20 = sld [smem:[#allocation8 + $0x46]]  ;;  %s1463_s21 = sld [smem:[#allocation8 + $0x41]] }
  0x3d   :  { %v469_v59 = vmul.f32 %v468_v57, %v1661_v47  ;;  %v311_v62 = vmul.f32 %v310_v60, %v1639_v27  ;;  %v524_v63 = vmul.f32 %v523_v61, %v1661_v47  ;;  %v422_v2 = vmul.f32 %v421_v0, %v1651_v38  ;;  %s1446_s23 = sld [smem:[#allocation8 + $0x30]]  ;;  %s1469_s24 = sld [smem:[#allocation8 + $0x47]]  ;;  %v1739_v61 = vld [vmem:[#allocation3 + $0x2] sm:$0x3f] }
  0x3e   :  { %v366_v3 = vmul.f32 %v365_v1, %v1639_v27  ;;  %v578_v6 = vmul.f32 %v577_v4, %v1661_v47  ;;  %v533_v7 = vmul.f32 %v532_v5, %v1661_v47  ;;  %v375_v10 = vmul.f32 %v374_v8, %v1639_v27  ;;  %s1470_s26 = sld [smem:[#allocation8 + $0x48]]  ;;  %s1458_s0 = sld [smem:[#allocation8 + $0x3c]] }
  0x3f   :  { %322 = vrot.lane.b32.xlu1 %v320_v32, %s1592_s9  ;;  %268 = vrot.lane.b32.xlu0 %v266_v33, %s1591_s6  ;;  %v588_v11 = vmul.f32 %v587_v9, %v1661_v47  ;;  %v486_v12 = vstv %s1430_s27  ;;  %v430_v13 = vstv %s1424_s28  ;;  %s1476_s27 = sld [smem:[#allocation8 + $0x4e]]  ;;  %s1475_s28 = sld [smem:[#allocation8 + $0x4d]] }
  0x40   :  { %v487_v14 = vmul.f32 %v486_v12, %v1661_v47  ;;  %v431_v15 = vmul.f32 %v430_v13, %v1651_v38  ;;  %v439_v16 = vstv %s1425_s29  ;;  %v596_v17 = vstv %s1442_s30  ;;  %s1465_s29 = sld [smem:[#allocation8 + $0x43]]  ;;  %s1459_s30 = sld [smem:[#allocation8 + $0x3d]] }
  0x41   :  { %v440_v18 = vmul.f32 %v439_v16, %v1651_v38  ;;  %v597_v19 = vmul.f32 %v596_v17, %v1661_v47  ;;  %v550_v20 = vstv %s1437_s4  ;;  %v495_v21 = vstv %s1431_s5  ;;  %s1482_s4 = sld [smem:[#allocation8 + $0x54]]  ;;  %s1477_s5 = sld [smem:[#allocation8 + $0x4f]] }
  0x42   :  { %v551_v22 = vmul.f32 %v550_v20, %v1661_v47  ;;  %v496_v23 = vmul.f32 %v495_v21, %v1661_v47  ;;  %v672_v25 = vstv %s1455_s7  ;;  %v663_v26 = vstv %s1454_s8  ;;  %s1460_s7 = sld [smem:[#allocation8 + $0x3e]]  ;;  %s1483_s8 = sld [smem:[#allocation8 + $0x55]] }
  0x43   :  { %341 = vrot.lane.b32.xlu1 %v339_v36, %s1592_s9  ;;  %332 = vrot.lane.b32.xlu0 %v330_v37, %s1592_s9  ;;  %v673_v28 = vmul.f32 %v672_v25, %v1703_v24  ;;  %v664_v29 = vmul.f32 %v663_v26, %v1703_v24  ;;  %v559_v30 = vstv %s1438_s10  ;;  %v504_v31 = vstv %s1432_s11  ;;  %s1472_s10 = sld [smem:[#allocation8 + $0x4a]]  ;;  %s1466_s11 = sld [smem:[#allocation8 + $0x44]] }
  0x44   :  { %v560_v32 = vmul.f32 %v559_v30, %v1661_v47  ;;  %v505_v33 = vmul.f32 %v504_v31, %v1661_v47  ;;  %v681_v34 = vstv %s1456_s12  ;;  %v614_v35 = vstv %s1444_s13  ;;  %s1489_s12 = sld [smem:[#allocation8 + $0x5b]]  ;;  %s1484_s13 = sld [smem:[#allocation8 + $0x56]] }
  0x45   :  { %v682_v36 = vmul.f32 %v681_v34, %v1703_v24  ;;  %v615_v37 = vmul.f32 %v614_v35, %v1661_v47  ;;  %v735_v39 = vstv %s1462_s15  ;;  %v726_v40 = vstv %s1461_s16  ;;  %s1467_s15 = sld [smem:[#allocation8 + $0x45]]  ;;  %s1490_s16 = sld [smem:[#allocation8 + $0x5c]] }
  0x46   :  { %v623_v43 = vstv %s1445_s17  ;;  %v568_v44 = vstv %s1439_s18  ;;  %v790_v49 = vstv %s1468_s20  ;;  %v632_v53 = vstv %s1446_s23  ;;  %s1479_s17 = sld [smem:[#allocation8 + $0x51]]  ;;  %s1473_s18 = sld [smem:[#allocation8 + $0x4b]] }
  0x47   :  { %397 = vrot.lane.b32.xlu1 %v395_v41, %s1593_s14  ;;  %387 = vrot.lane.b32.xlu0 %v385_v42, %s1593_s14  ;;  %v736_v41 = vmul.f32 %v735_v39, %v1703_v24  ;;  %v727_v42 = vmul.f32 %v726_v40, %v1703_v24  ;;  %v808_v57 = vstv %s1470_s26  ;;  %s1474_s20 = sld [smem:[#allocation8 + $0x4c]]  ;;  %s1486_s23 = sld [smem:[#allocation8 + $0x58]] }
  0x48   :  { %s1487_s26 = sld [smem:[#allocation8 + $0x59]] }
  0x4b   :  { %406 = vrot.lane.b32.xlu1 %v404_v45, %s1593_s14  ;;  %295 = vrot.lane.b32.xlu0 %v293_v46, %s1591_s6  ;;  %v624_v45 = vmul.f32 %v623_v43, %v1661_v47  ;;  %v569_v46 = vmul.f32 %v568_v44, %v1661_v47 }
  0x4d   :  { %v844_v34 = vstv %s1474_s20  ;;  %s1845_s20 = sld [smem:[#allocation8 + $0x5e]] }
  0x4e   :  { %v845_v39 = vmul.f32 %v844_v34, %v1725_v48 }
  0x4f   :  { %462 = vrot.lane.b32.xlu1 %v460_v50, %s1594_s19  ;;  %452 = vrot.lane.b32.xlu0 %v450_v51, %s1594_s19  ;;  %v744_v50 = vstv %s1463_s21  ;;  %v791_v51 = vmul.f32 %v790_v49, %v1725_v48  ;;  %s1491_s21 = sld [smem:[#allocation8 + $0x5d]]  ;;  %v962_v49 = vstv %s1487_s26 }
  0x50   :  { %v745_v52 = vmul.f32 %v744_v50, %v1703_v24  ;;  %s2039_s26 = sld [smem:[#allocation8 + $0x35]] }
  0x53   :  { %359 = vrot.lane.b32.xlu1 %v357_v54, %s1592_s9  ;;  %304 = vrot.lane.b32.xlu0 %v302_v55, %s1591_s6  ;;  %v799_v54 = vstv %s1469_s24  ;;  %v633_v55 = vmul.f32 %v632_v53, %v1661_v47  ;;  %s1480_s24 = sld [smem:[#allocation8 + $0x52]]  ;;  %v963_v53 = vmul.f32 %v962_v49, %v1739_v61 }
  0x54   :  { %v800_v56 = vmul.f32 %v799_v54, %v1725_v48 }
  0x55   :  { %v998_v35 = vstv %s1491_s21  ;;  %s1847_s21 = sld [smem:[#allocation8 + $0x6]] }
  0x56   :  { %v999_v40 = vmul.f32 %v998_v35, %v1739_v61 }
  0x57   :  { %516 = vrot.lane.b32.xlu1 %v514_v58, %s1595_s25  ;;  %471 = vrot.lane.b32.xlu0 %v469_v59, %s1594_s19  ;;  %v699_v58 = vstv %s1458_s0  ;;  %v809_v59 = vmul.f32 %v808_v57, %v1725_v48  ;;  %s1481_s0 = sld [smem:[#allocation8 + $0x53]] }
  0x58   :  { %v700_v60 = vmul.f32 %v699_v58, %v1703_v24 }
  0x5b   :  { %313 = vrot.lane.b32.xlu1 %v311_v62, %s1591_s6  ;;  %526 = vrot.lane.b32.xlu0 %v524_v63, %s1595_s25  ;;  %v863_v62 = vstv %s1476_s27  ;;  %v854_v63 = vstv %s1475_s28  ;;  %s1488_s27 = sld [smem:[#allocation8 + $0x5a]]  ;;  %s1493_s28 = sld [smem:[#allocation8 + $0x5f]] }
  0x5c   :  { %v864_v0 = vmul.f32 %v863_v62, %v1739_v61  ;;  %v855_v1 = vmul.f32 %v854_v63, %v1739_v61 }
  0x5d   :  { %v908_v50 = vstv %s1481_s0  ;;  %s2055_s0 = sld [smem:[#allocation8 + $0x36]] }
  0x5e   :  { %v909_v54 = vmul.f32 %v908_v50, %v1739_v61  ;;  %v1007_v50 = vstv %s1845_s20 }
  0x5f   :  { %424 = vrot.lane.b32.xlu1 %v422_v2, %s1593_s14  ;;  %368 = vrot.lane.b32.xlu0 %v366_v3, %s1592_s9  ;;  %v762_v2 = vstv %s1465_s29  ;;  %v708_v3 = vstv %s1459_s30  ;;  %s1495_s29 = sld [smem:[#allocation8 + $0x61]]  ;;  %s1494_s30 = sld [smem:[#allocation8 + $0x60]] }
  0x60   :  { %v763_v4 = vmul.f32 %v762_v2, %v1703_v24  ;;  %v709_v5 = vmul.f32 %v708_v3, %v1703_v24 }
  0x63   :  { %580 = vrot.lane.b32.xlu1 %v578_v6, %s1596_s3  ;;  %535 = vrot.lane.b32.xlu0 %v533_v7, %s1595_s25  ;;  %v917_v6 = vstv %s1482_s4  ;;  %v872_v7 = vstv %s1477_s5  ;;  %s1408_s4 = sld [smem:[#allocation8 + $0xa]]  ;;  %s1415_s5 = sld [smem:[#allocation8 + $0x11]] }
  0x64   :  { %v918_v8 = vmul.f32 %v917_v6, %v1739_v61  ;;  %v873_v9 = vmul.f32 %v872_v7, %v1739_v61 }
  0x65   :  { %v1034_v62 = vstv %s1495_s29  ;;  %v1025_v63 = vstv %s1494_s30  ;;  %s2167_s29 = sld [smem:[#allocation8 + $0x34]]  ;;  %s1598_s30 = smov 3  }
  0x66   :  { %v1035_v2 = vmul.f32 %v1034_v62, %v1739_v61  ;;  %v1026_v3 = vmul.f32 %v1025_v63, %v1739_v61 }
  0x67   :  { %377 = vrot.lane.b32.xlu1 %v375_v10, %s1592_s9  ;;  %590 = vrot.lane.b32.xlu0 %v588_v11, %s1596_s3  ;;  %v717_v10 = vstv %s1460_s7  ;;  %v926_v11 = vstv %s1483_s8  ;;  %s1422_s7 = sld [smem:[#allocation8 + $0x18]]  ;;  %s1429_s8 = sld [smem:[#allocation8 + $0x1f]] }
  0x68   :  { %v718_v12 = vmul.f32 %v717_v10, %v1703_v24  ;;  %v927_v13 = vmul.f32 %v926_v11, %v1739_v61 }
  0x6b   :  { %489 = vrot.lane.b32.xlu1 %v487_v14, %s1594_s19  ;;  %433 = vrot.lane.b32.xlu0 %v431_v15, %s1593_s14  ;;  %v826_v14 = vstv %s1472_s10  ;;  %v771_v15 = vstv %s1466_s11  ;;  %s1436_s10 = sld [smem:[#allocation8 + $0x26]]  ;;  %s1443_s11 = sld [smem:[#allocation8 + $0x2d]] }
  0x6c   :  { %v827_v16 = vmul.f32 %v826_v14, %v1725_v48  ;;  %v772_v17 = vmul.f32 %v771_v15, %v1703_v24 }
  0x6d   :  { %v412_v10 = vstv %s1422_s7  ;;  %v477_v11 = vstv %s1429_s8  ;;  %s1602_s7 = smov 126   ;;  %s1603_s8 = smov 125  }
  0x6e   :  { %v413_v14 = vmul.f32 %v412_v10, %v1651_v38  ;;  %v478_v15 = vmul.f32 %v477_v11, %v1661_v47 }
  0x6f   :  { %442 = vrot.lane.b32.xlu1 %v440_v18, %s1593_s14  ;;  %599 = vrot.lane.b32.xlu0 %v597_v19, %s1596_s3  ;;  %v980_v18 = vstv %s1489_s12  ;;  %v935_v19 = vstv %s1484_s13  ;;  %s1457_s12 = sld [smem:[#allocation8 + $0x3b]]  ;;  %s1464_s13 = sld [smem:[#allocation8 + $0x42]] }
  0x70   :  { %v981_v20 = vmul.f32 %v980_v18, %v1739_v61  ;;  %v936_v21 = vmul.f32 %v935_v19, %v1739_v61 }
  0x73   :  { %553 = vrot.lane.b32.xlu1 %v551_v22, %s1595_s25  ;;  %498 = vrot.lane.b32.xlu0 %v496_v23, %s1594_s19  ;;  %v780_v22 = vstv %s1467_s15  ;;  %v989_v23 = vstv %s1490_s16  ;;  %s1827_s15 = sld [smem:[#allocation8 + $0x4]]  ;;  %s1833_s16 = sld [smem:[#allocation8 + $0x49]] }
  0x74   :  { %v781_v25 = vmul.f32 %v780_v22, %v1703_v24  ;;  %v990_v26 = vmul.f32 %v989_v23, %v1739_v61 }
  0x75   :  { %v753_v22 = vstv %s1464_s13 }
  0x77   :  { %675 = vrot.lane.b32.xlu1 %v673_v28, %s1591_s6  ;;  %666 = vrot.lane.b32.xlu0 %v664_v29, %s1591_s6  ;;  %v890_v28 = vstv %s1479_s17  ;;  %v835_v29 = vstv %s1473_s18  ;;  %s1835_s17 = sld [smem:[#allocation8 + $0x50]]  ;;  %s1843_s18 = sld [smem:[#allocation8 + $0x57]] }
  0x7b   :  { %562 = vrot.lane.b32.xlu1 %v560_v32, %s1595_s25  ;;  %507 = vrot.lane.b32.xlu0 %v505_v33, %s1594_s19  ;;  %v891_v32 = vmul.f32 %v890_v28, %v1739_v61  ;;  %v836_v33 = vmul.f32 %v835_v29, %v1725_v48  ;;  %v754_v28 = vmul.f32 %v753_v22, %v1703_v24 }
  0x7d   :  { %v944_v49 = vstv %s1843_s18 }
  0x7f   :  { %684 = vrot.lane.b32.xlu1 %v682_v36, %s1591_s6  ;;  %617 = vrot.lane.b32.xlu0 %v615_v37, %s1596_s3 }
  0x83   :  { %738 = vrot.lane.b32.xlu1 %v736_v41, %s1592_s9  ;;  %729 = vrot.lane.b32.xlu0 %v727_v42, %s1592_s9  ;;  %v953_v41 = vstv %s1486_s23  ;;  %v899_v42 = vstv %s1480_s24  ;;  %s1855_s23 = sld [smem:[#allocation8 + $0x5]]  ;;  %s1970_s24 = sld [smem:[#allocation8 + $0x33]] }
  0x87   :  { %626 = vrot.lane.b32.xlu1 %v624_v45, %s1596_s3  ;;  %571 = vrot.lane.b32.xlu0 %v569_v46, %s1595_s25  ;;  %v954_v45 = vmul.f32 %v953_v41, %v1739_v61  ;;  %v900_v46 = vmul.f32 %v899_v42, %v1739_v61 }
  0x89   :  { %v249_v62 = vstv %s1855_s23 }
  0x8b   :  { %793 = vrot.lane.b32.xlu1 %v791_v51, %s1593_s14  ;;  %747 = vrot.lane.b32.xlu0 %v745_v52, %s1592_s9 }
  0x8f   :  { %635 = vrot.lane.b32.xlu1 %v633_v55, %s1596_s3  ;;  %802 = vrot.lane.b32.xlu0 %v800_v56, %s1593_s14  ;;  %v971_v55 = vstv %s1488_s27  ;;  %v1016_v56 = vstv %s1493_s28  ;;  %s2064_s27 = sld [smem:[#allocation8 + $0x37]]  ;;  %s2139_s28 = sld [smem:[#allocation8 + $0x3]] }
  0x93   :  { %811 = vrot.lane.b32.xlu1 %v809_v59, %s1593_s14  ;;  %702 = vrot.lane.b32.xlu0 %v700_v60, %s1591_s6  ;;  %v972_v59 = vmul.f32 %v971_v55, %v1739_v61  ;;  %v1017_v60 = vmul.f32 %v1016_v56, %v1739_v61  ;;  %v252_v56 = vstv %s1847_s21 }
  0x97   :  { %866 = vrot.lane.b32.xlu1 %v864_v0, %s1594_s19  ;;  %857 = vrot.lane.b32.xlu0 %v855_v1, %s1594_s19 }
  0x9b   :  { %765 = vrot.lane.b32.xlu1 %v763_v4, %s1592_s9  ;;  %711 = vrot.lane.b32.xlu0 %v709_v5, %s1591_s6  ;;  %v283_v4 = vstv %s1408_s4  ;;  %v347_v5 = vstv %s1415_s5  ;;  %s1599_s4 = smov 2   ;;  %s1601_s5 = smov 127  }
  0x9f   :  { %920 = vrot.lane.b32.xlu1 %v918_v8, %s1595_s25  ;;  %875 = vrot.lane.b32.xlu0 %v873_v9, %s1594_s19  ;;  %v284_v8 = vmul.f32 %v283_v4, %v1639_v27  ;;  %v348_v9 = vmul.f32 %v347_v5, %v1639_v27  ;;  %v253_v5 = vmul.f32 %v252_v56, %v1639_v27 }
  0xa3   :  { %720 = vrot.lane.b32.xlu1 %v718_v12, %s1591_s6  ;;  %929 = vrot.lane.b32.xlu0 %v927_v13, %s1595_s25 }
  0xa7   :  { %829 = vrot.lane.b32.xlu1 %v827_v16, %s1593_s14  ;;  %774 = vrot.lane.b32.xlu0 %v772_v17, %s1592_s9  ;;  %v541_v16 = vstv %s1436_s10  ;;  %v605_v17 = vstv %s1443_s11  ;;  %s1605_s10 = smov [#allocation9]  }
  0xa8   :  { %v606_v38 = vmul.f32 %v605_v17, %v1661_v47  ;;  %s1386_s11 = sshll.u32 %s1605_s10, 4  ;;  %s1387_s11 = int_to_ptr.vmem [resolvable:$true] %s1386_s11 }
  0xa9   :  { %p1563_p0 = scmp.lt.s32.totalorder %s1387_s11, %s1387_s11 }
  0xab   :  { %983 = vrot.lane.b32.xlu1 %v981_v20, %s1596_s3  ;;  %938 = vrot.lane.b32.xlu0 %v936_v21, %s1595_s25  ;;  %v542_v20 = vmul.f32 %v541_v16, %v1661_v47  ;;  %v690_v21 = vstv %s1457_s12  ;;  %v246_v47 = vstv %s1827_s15  ;;  %s1558_s12 = scalar_lea.vmem %s1387_s11, 256 }
  0xac   :  { %p1559_p13 = scmp.ne.s32.totalorder %s1387_s11, %s1558_s12  ;;  %p1564_p1 = scmp.lt.s32.totalorder %s1558_s12, %s1558_s12 }
  0xad   :  { %v1769_v30 = vpop.permute.xlu1 %277  ;;  %v1771_v31 = vpop.permute.xlu0 %258 }
  0xae   :  { %p1565_p2 = por %p1564_p1, %p1563_p0 }
  0xaf   :  { %783 = vrot.lane.b32.xlu1 %v781_v25, %s1592_s9  ;;  %992 = vrot.lane.b32.xlu0 %v990_v26, %s1596_s3  ;;  %v691_v26 = vmul.f32 %v690_v21, %v1703_v24 }
  0xb0   :  { %p1566_p3 = pnand %p1565_p2, %p1559_p13 }
  0xb1   :  { %v1777_v36 = vpop.permute.xlu1 %322  ;;  %v1779_v37 = vpop.permute.xlu0 %268 }
  0xb3   :  { %893 = vrot.lane.b32.xlu1 %v891_v32, %s1594_s19  ;;  %838 = vrot.lane.b32.xlu0 %v836_v33, %s1593_s14  ;;  %v817_v32 = vstv %s1833_s16  ;;  %v881_v33 = vstv %s1835_s17 }
  0xb4   :  { %v818_v41 = vmul.f32 %v817_v32, %v1725_v48  ;;  %v882_v42 = vmul.f32 %v881_v33, %v1739_v61  ;;  %v945_v48 = vmul.f32 %v944_v49, %v1739_v61 }
  0xb5   :  { %v1785_v43 = vpop.permute.xlu1 %341  ;;  %v1787_v44 = vpop.permute.xlu0 %332 }
  0xb7   :  { %847 = vrot.lane.b32.xlu1 %v845_v39, %s1593_s14  ;;  %1001 = vrot.lane.b32.xlu0 %v999_v40, %s1596_s3  ;;  %v247_v40 = vmul.f32 %v246_v47, %v1639_v27 }
  0xb9   :  { %v1793_v51 = vpop.permute.xlu1 %397  ;;  %v1795_v52 = vpop.permute.xlu0 %387 }
  0xbb   :  { %956 = vrot.lane.b32.xlu1 %v954_v45, %s1595_s25  ;;  %902 = vrot.lane.b32.xlu0 %v900_v46, %s1594_s19 }
  0xbd   :  { %v1801_v57 = vpop.permute.xlu1 %406  ;;  %v1803_v58 = vpop.permute.xlu0 %295 }
  0xbe   :  { %v297_v29 = vrot.slane %v1803_v58, 2 }
  0xbf   :  { %965 = vrot.lane.b32.xlu1 %v963_v53, %s1595_s25  ;;  %911 = vrot.lane.b32.xlu0 %v909_v54, %s1594_s19 }
  0xc0   :  { %v298_v45 = vsel %vm261_vm0, %v1803_v58, %v297_v29  ;;  %v1008_v58 = vmul.f32 %v1007_v50, %v1739_v61 }
  0xc1   :  { %v1809_v0 = vpop.permute.xlu1 %462  ;;  %v1811_v1 = vpop.permute.xlu0 %452 }
  0xc3   :  { %974 = vrot.lane.b32.xlu1 %v972_v59, %s1595_s25  ;;  %1019 = vrot.lane.b32.xlu0 %v1017_v60, %s1596_s3  ;;  %v300_v60 = vadd.f32 %v298_v45, %v247_v40 }
  0xc5   :  { %v360_v6 = vpop.permute.xlu1 %359  ;;  %v1817_v7 = vpop.permute.xlu0 %304 }
  0xc6   :  { %v361_v39 = vrot.slane %v360_v6, 2  ;;  %v306_v63 = vrot.slane %v1817_v7, 2 }
  0xc7   :  { %1037 = vrot.lane.b32.xlu1 %v1035_v2, %s1596_s3  ;;  %1028 = vrot.lane.b32.xlu0 %v1026_v3, %s1596_s3 }
  0xc8   :  { %v362_v55 = vsel %vm325_vm1, %v360_v6, %v361_v39  ;;  %v307_v61 = vsel %vm261_vm0, %v1817_v7, %v306_v63 }
  0xc9   :  { %v1823_v12 = vpop.permute.xlu1 %516  ;;  %v1825_v13 = vpop.permute.xlu0 %471  ;;  %v364_v4 = vadd.f32 %v362_v55, %v300_v60 }
  0xcb   :  { %286 = vrot.lane.b32.xlu0 %v284_v8, %s1591_s6  ;;  %350 = vrot.lane.b32.xlu1 %v348_v9, %s1592_s9 }
  0xcd   :  { %v314_v18 = vpop.permute.xlu1 %313  ;;  %v1837_v19 = vpop.permute.xlu0 %526 }
  0xce   :  { %v315_v59 = vrot.slane %v314_v18, 2 }
  0xcf   :  { %415 = vrot.lane.b32.xlu0 %v413_v14, %s1593_s14  ;;  %480 = vrot.lane.b32.xlu1 %v478_v15, %s1594_s19  ;;  %v250_v14 = vmul.f32 %v249_v62, %v1639_v27 }
  0xd0   :  { %v316_v9 = vsel %vm261_vm0, %v314_v18, %v315_v59 }
  0xd1   :  { %v425_v23 = vpop.permute.xlu1 %424  ;;  %v369_v25 = vpop.permute.xlu0 %368 }
  0xd2   :  { %v426_v46 = vrot.slane %v425_v23, 6  ;;  %v370_v10 = vrot.slane %v369_v25, 2 }
  0xd3   :  { %544 = vrot.lane.b32.xlu0 %v542_v20, %s1595_s25  ;;  %608 = vrot.lane.b32.xlu1 %v606_v38, %s1596_s3  ;;  %v318_v38 = vadd.f32 %v316_v9, %v253_v5 }
  0xd4   :  { %v427_v2 = vsel %vm390_vm2, %v426_v46, %v425_v23  ;;  %v371_v23 = vsel %vm325_vm1, %v369_v25, %v370_v10 }
  0xd5   :  { %v1859_v34 = vpop.permute.xlu1 %580  ;;  %v1861_v35 = vpop.permute.xlu0 %535  ;;  %v429_v15 = vadd.f32 %v427_v2, %v364_v4 }
  0xd7   :  { %693 = vrot.lane.b32.xlu0 %v691_v26, %s1591_s6  ;;  %756 = vrot.lane.b32.xlu1 %v754_v28, %s1592_s9  ;;  %v309_v28 = vadd.f32 %v307_v61, %v250_v14  ;;  %s43_s6 = sld [smem:[#allocation8]]  ;;  %s1399_s9 = sld [smem:[#allocation8 + $0x1]] }
  0xd9   :  { %v378_v53 = vpop.permute.xlu1 %377  ;;  %v1872_v54 = vpop.permute.xlu0 %590  ;;  %v373_v7 = vadd.f32 %v371_v23, %v309_v28  ;;  %v389_v23 = vrot.slane %v1795_v52, 6 }
  0xda   :  { %v379_v3 = vrot.slane %v378_v53, 2 }
  0xdb   :  { %820 = vrot.lane.b32.xlu0 %v818_v41, %s1593_s14  ;;  %884 = vrot.lane.b32.xlu1 %v882_v42, %s1594_s19  ;;  %s1928_s14 = sld [smem:[#allocation8 + $0x2]] }
  0xdc   :  { %v380_v16 = vsel %vm325_vm1, %v378_v53, %v379_v3  ;;  %s1936_s19 = sld [smem:[#allocation8 + $0x32]] }
  0xdd   :  { %v490_v6 = vpop.permute.xlu1 %489  ;;  %v434_v8 = vpop.permute.xlu0 %433  ;;  %v382_v47 = vadd.f32 %v380_v16, %v318_v38  ;;  %v234_v14 = vstv %s43_s6 }
  0xde   :  { %v491_v11 = vrot.slane %v490_v6, 6  ;;  %v435_v20 = vrot.slane %v434_v8, 6 }
  0xdf   :  { %947 = vrot.lane.b32.xlu0 %v945_v48, %s1595_s25  ;;  %1010 = vrot.lane.b32.xlu1 %v1008_v58, %s1596_s3  ;;  %s1942_s3 = sld [smem:[#allocation8 + $0x31]] }
  0xe0   :  { %v492_v17 = vsel %vm455_vm3, %v491_v11, %v490_v6  ;;  %v436_v29 = vsel %vm390_vm2, %v435_v20, %v434_v8  ;;  %v235_v20 = vmul.f32 %v234_v14, %v1639_v27 }
  0xe1   :  { %v494_v18 = vadd.f32 %v492_v17, %v429_v15  ;;  %v443_v21 = vpop.permute.xlu1 %442  ;;  %v1892_v22 = vpop.permute.xlu0 %599  ;;  %v438_v45 = vadd.f32 %v436_v29, %v373_v7  ;;  %v260_v15 = vrot.slane %v1771_v31, 2  ;;  %v324_v17 = vrot.slane %v1777_v36, 2 }
  0xe2   :  { %v444_v26 = vrot.slane %v443_v21, 6  ;;  %v334_v29 = vrot.slane %v1787_v44, 2 }
  0xe3   :  { %v262_v38 = vsel %vm261_vm0, %v1771_v31, %v260_v15 }
  0xe4   :  { %v445_v32 = vsel %vm390_vm2, %v444_v26, %v443_v21  ;;  %v270_v21 = vrot.slane %v1779_v37, 2  ;;  %v264_v31 = vadd.f32 %v262_v38, %v235_v20 }
  0xe5   :  { %v447_v33 = vadd.f32 %v445_v32, %v382_v47  ;;  %v554_v39 = vpop.permute.xlu1 %553  ;;  %v499_v40 = vpop.permute.xlu0 %498  ;;  %v326_v47 = vsel %vm325_vm1, %v1777_v36, %v324_v17  ;;  %v454_v32 = vrot.slane %v1811_v1, 6  ;;  %v642_v17 = vstv %s1942_s3 }
  0xe6   :  { %v555_v41 = vrot.slane %v554_v39, 6  ;;  %v500_v42 = vrot.slane %v499_v40, 6  ;;  %v328_v36 = vadd.f32 %v326_v47, %v264_v31 }
  0xe8   :  { %v556_v46 = vsel %vm519_vm4, %v555_v41, %v554_v39  ;;  %v501_v49 = vsel %vm455_vm3, %v500_v42, %v499_v40  ;;  %v399_v39 = vrot.slane %v1793_v51, 6  ;;  %v391_v40 = vsel %vm390_vm2, %v389_v23, %v1795_v52 }
  0xe9   :  { %v1899_v25 = vadd.f32 %v556_v46, %v494_v18  ;;  %v503_v50 = vadd.f32 %v501_v49, %v438_v45  ;;  %v1901_v53 = vpop.permute.xlu1 %675  ;;  %v1903_v55 = vpop.permute.xlu0 %666  ;;  %v237_v18 = vstv %s1399_s9  ;;  %v518_v41 = vrot.slane %v1823_v12, 6 }
  0xea   :  { %v238_v7 = vmul.f32 %v237_v18, %v1639_v27  ;;  %v240_v42 = vstv %s1928_s14  ;;  %v335_v49 = vsel %vm325_vm1, %v1787_v44, %v334_v29  ;;  %v343_v18 = vrot.slane %v1785_v43, 2 }
  0xeb   :  { %v520_v44 = vsel %vm519_vm4, %v518_v41, %v1823_v12  ;;  %v592_v12 = vrot.slane %v1872_v54, 6 }
  0xed   :  { %v563_v56 = vpop.permute.xlu1 %562  ;;  %v508_v59 = vpop.permute.xlu0 %507 }
  0xee   :  { %v564_v60 = vrot.slane %v563_v56, 6  ;;  %v509_v48 = vrot.slane %v508_v59, 6 }
  0xf0   :  { %v565_v58 = vsel %vm519_vm4, %v564_v60, %v563_v56  ;;  %v510_v62 = vsel %vm455_vm3, %v509_v48, %v508_v59  ;;  %v582_v56 = vrot.slane %v1859_v34, 6  ;;  %v393_v59 = vadd.f32 %v391_v40, %v328_v36 }
  0xf1   :  { %v1907_v63 = vadd.f32 %v565_v58, %v503_v50  ;;  %v1909_v2 = vadd.f32 %v510_v62, %v447_v33  ;;  %v1911_v3 = vpop.permute.xlu1 %684  ;;  %v1913_v4 = vpop.permute.xlu0 %617  ;;  %v271_v33 = vsel %vm261_vm0, %v1779_v37, %v270_v21  ;;  %v464_v37 = vrot.slane %v1809_v0, 6 }
  0xf2   :  { %v456_v50 = vsel %vm455_vm3, %v454_v32, %v1811_v1  ;;  %v273_v52 = vadd.f32 %v271_v33, %v238_v7  ;;  %v645_v60 = vstv %s1936_s19  ;;  %v279_v48 = vrot.slane %v1769_v30, 2 }
  0xf3   :  { %v400_v58 = vsel %vm390_vm2, %v399_v39, %v1793_v51  ;;  %v528_v62 = vrot.slane %v1837_v19, 6  ;;  %v241_v1 = vmul.f32 %v240_v42, %v1639_v27  ;;  %v458_v15 = vadd.f32 %v456_v50, %v393_v59 }
  0xf4   :  { %v337_v14 = vadd.f32 %v335_v49, %v273_v52  ;;  %v465_v21 = vsel %vm455_vm3, %v464_v37, %v1809_v0  ;;  %v584_v51 = vsel %vm583_vm5, %v582_v56, %v1859_v34  ;;  %v646_v47 = vmul.f32 %v645_v60, %v1703_v24 }
  0xf5   :  { %v1915_v5 = vpop.permute.xlu1 %738  ;;  %v1917_v6 = vpop.permute.xlu0 %729  ;;  %v522_v27 = vadd.f32 %v520_v44, %v458_v15  ;;  %v280_v29 = vsel %vm261_vm0, %v1769_v30, %v279_v48  ;;  %v408_v32 = vrot.slane %v1801_v57, 6  ;;  %v529_v31 = vsel %vm519_vm4, %v528_v62, %v1837_v19 }
  0xf6   :  { %v402_v23 = vadd.f32 %v400_v58, %v337_v14  ;;  %v668_v0 = vrot.slane %v1903_v55, 2  ;;  %v473_v34 = vrot.slane %v1825_v13, 6  ;;  %v643_v39 = vmul.f32 %v642_v17, %v1703_v24 }
  0xf7   :  { %v586_v33 = vadd.f32 %v584_v51, %v522_v27  ;;  %v344_v42 = vsel %vm325_vm1, %v1785_v43, %v343_v18  ;;  %v593_v30 = vsel %vm583_vm5, %v592_v12, %v1872_v54  ;;  %v648_v36 = vstv %s1970_s24 }
  0xf8   :  { %v467_v7 = vadd.f32 %v465_v21, %v402_v23  ;;  %v731_v19 = vrot.slane %v1917_v6, 2  ;;  %v282_v49 = vadd.f32 %v280_v29, %v241_v1  ;;  %v537_v50 = vrot.slane %v1861_v35, 6 }
  0xf9   :  { %v1919_v8 = vpop.permute.xlu1 %626  ;;  %v1921_v9 = vpop.permute.xlu0 %571  ;;  %v1597_v56 = vmov 1983009808   ;;  %v409_v59 = vsel %vm390_vm2, %v408_v32, %v1801_v57  ;;  %v677_v60 = vrot.slane %v1901_v53, 2  ;;  %v669_v43 = vsel %vm261_vm0, %v1903_v55, %v668_v0 }
  0xfa   :  { %v531_v37 = vadd.f32 %v529_v31, %v467_v7  ;;  %v1046_v52 = vunpack.c.l.s4 %v1597_v56  ;;  %v346_v54 = vadd.f32 %v344_v42, %v282_v49  ;;  %v474_v58 = vsel %vm455_vm3, %v473_v34, %v1825_v13 }
  0xfb   :  { %v644_v62 = vadd.f32 %v643_v39, %v586_v33  ;;  %v601_v15 = vrot.slane %v1892_v22, 6  ;;  %v740_v57 = vrot.slane %v1915_v5, 2  ;;  %v732_v17 = vsel %vm325_vm1, %v1917_v6, %v731_v19 }
  0xfc   :  { %v595_v44 = vadd.f32 %v593_v30, %v531_v37  ;;  %v411_v18 = vadd.f32 %v409_v59, %v346_v54  ;;  %v538_v21 = vsel %vm519_vm4, %v537_v50, %v1861_v35  ;;  %v141_v13 = vlaneseq }
  0xfd   :  { %v1923_v10 = vpop.permute.xlu1 %793  ;;  %v1925_v11 = vpop.permute.xlu0 %747  ;;  %v671_v51 = vadd.f32 %v669_v43, %v644_v62  ;;  %v678_v12 = vsel %vm261_vm0, %v1901_v53, %v677_v60  ;;  %v1047_v34 = vunpack.c.0.s8 %v1046_v52  ;;  %v602_v35 = vsel %vm583_vm5, %v601_v15, %v1892_v22 }
  0xfe   :  { %v795_v48 = vrot.slane %v1923_v10, 6  ;;  %v476_v32 = vadd.f32 %v474_v58, %v411_v18  ;;  %v647_v31 = vadd.f32 %v646_v47, %v595_v44  ;;  %v741_v53 = vsel %vm325_vm1, %v1915_v5, %v740_v57 }
  0xff   :  { %v734_v6 = vadd.f32 %v732_v17, %v671_v51  ;;  %v2045_v30 = vshrl.u32 %v141_v13, 7  ;;  %v686_v19 = vrot.slane %v1911_v3, 2  ;;  %v649_v50 = vmul.f32 %v648_v36, %v1703_v24 }
 0x100   :  { %v796_v23 = vsel %vm390_vm2, %v795_v48, %v1923_v10  ;;  %v540_v47 = vadd.f32 %v538_v21, %v476_v32  ;;  %v680_v39 = vadd.f32 %v678_v12, %v647_v31  ;;  %v749_v60 = vrot.slane %v1925_v11, 2 }
 0x101   :  { %v1930_v61 = vpop.permute.xlu1 %635  ;;  %v1932_v16 = vpop.permute.xlu0 %802  ;;  %v798_v42 = vadd.f32 %v796_v23, %v734_v6  ;;  %v2059_v58 = vsub.s32 %v1047_v34, %v2045_v30  ;;  %v687_v36 = vsel %vm261_vm0, %v1911_v3, %v686_v19  ;;  %v654_v51 = vstv %s2039_s26 }
 0x102   :  { %v804_v27 = vrot.slane %v1932_v16, 6  ;;  %v604_v37 = vadd.f32 %v602_v35, %v540_v47  ;;  %v743_v56 = vadd.f32 %v741_v53, %v680_v39  ;;  %v750_v21 = vsel %vm325_vm1, %v1925_v11, %v749_v60 }
 0x103   :  { %v628_v11 = vrot.slane %v1919_v8, 6  ;;  %v655_v39 = vmul.f32 %v654_v51, %v1703_v24 }
 0x104   :  { %v805_v22 = vsel %vm390_vm2, %v804_v27, %v1932_v16  ;;  %v619_v16 = vrot.slane %v1913_v4, 6  ;;  %v650_v15 = vadd.f32 %v649_v50, %v604_v37  ;;  %v660_v50 = vstv %s2064_s27 }
 0x105   :  { %v1944_v26 = vpop.permute.xlu1 %811  ;;  %v1946_v28 = vpop.permute.xlu0 %702 }
 0x106   :  { %v813_v44 = vrot.slane %v1944_v26, 6  ;;  %v689_v23 = vadd.f32 %v687_v36, %v650_v15  ;;  %v620_v32 = vsel %vm583_vm5, %v619_v16, %v1913_v4  ;;  %v573_v4 = vrot.slane %v1921_v9, 6 }
 0x107   :  { %v622_v19 = vadd.f32 %v620_v32, %v1899_v25  ;;  %v704_v37 = vrot.slane %v1946_v28, 2  ;;  %v637_v16 = vrot.slane %v1930_v61, 6 }
 0x108   :  { %v814_v31 = vsel %vm390_vm2, %v813_v44, %v1944_v26  ;;  %v752_v35 = vadd.f32 %v750_v21, %v689_v23  ;;  %v657_v26 = vstv %s2055_s0 }
 0x109   :  { %v1960_v45 = vpop.permute.xlu1 %866  ;;  %v1962_v46 = vpop.permute.xlu0 %857 }
 0x10a   :  { %v859_v55 = vrot.slane %v1962_v46, 6  ;;  %v868_v10 = vrot.slane %v1960_v45, 6 }
 0x10c   :  { %v860_v33 = vsel %vm455_vm3, %v859_v55, %v1962_v46  ;;  %v869_v43 = vsel %vm455_vm3, %v868_v10, %v1960_v45 }
 0x10d   :  { %v1981_v20 = vpop.permute.xlu1 %765  ;;  %v1983_v38 = vpop.permute.xlu0 %711  ;;  %v862_v52 = vadd.f32 %v860_v33, %v798_v42 }
 0x111   :  { %v921_v40 = vpop.permute.xlu1 %920  ;;  %v2000_v41 = vpop.permute.xlu0 %875 }
 0x112   :  { %v922_v29 = vrot.slane %v921_v40, 6  ;;  %v877_v3 = vrot.slane %v2000_v41, 6 }
 0x114   :  { %v923_v5 = vsel %vm519_vm4, %v922_v29, %v921_v40  ;;  %v807_v40 = vadd.f32 %v805_v22, %v743_v56  ;;  %v878_v42 = vsel %vm455_vm3, %v877_v3, %v2000_v41  ;;  %v816_v22 = vadd.f32 %v814_v31, %v752_v35 }
 0x115   :  { %v2017_v1 = vpop.permute.xlu1 %720  ;;  %v930_v14 = vpop.permute.xlu0 %929  ;;  %v925_v54 = vadd.f32 %v923_v5, %v862_v52  ;;  %v629_v52 = vsel %vm583_vm5, %v628_v11, %v1919_v8  ;;  %v661_v8 = vmul.f32 %v660_v50, %v1703_v24 }
 0x116   :  { %v931_v49 = vrot.slane %v930_v14, 6  ;;  %v871_v57 = vadd.f32 %v869_v43, %v807_v40  ;;  %v880_v41 = vadd.f32 %v878_v42, %v816_v22  ;;  %v767_v40 = vrot.slane %v1981_v20, 2 }
 0x118   :  { %v932_v45 = vsel %vm519_vm4, %v931_v49, %v930_v14  ;;  %v768_v3 = vsel %vm325_vm1, %v1981_v20, %v767_v40 }
 0x119   :  { %v2031_v0 = vpop.permute.xlu1 %829  ;;  %v2033_v7 = vpop.permute.xlu0 %774  ;;  %v934_v27 = vadd.f32 %v932_v45, %v871_v57  ;;  %v705_v45 = vsel %vm261_vm0, %v1946_v28, %v704_v37  ;;  %v631_v57 = vadd.f32 %v629_v52, %v1907_v63  ;;  %v638_v28 = vsel %vm583_vm5, %v637_v16, %v1930_v61 }
 0x11a   :  { %v831_v15 = vrot.slane %v2031_v0, 6 }
 0x11c   :  { %v832_v61 = vsel %vm390_vm2, %v831_v15, %v2031_v0 }
 0x11d   :  { %v984_v46 = vpop.permute.xlu1 %983  ;;  %v939_v59 = vpop.permute.xlu0 %938 }
 0x11e   :  { %v985_v48 = vrot.slane %v984_v46, 6  ;;  %v940_v6 = vrot.slane %v939_v59, 6 }
 0x120   :  { %v986_v62 = vsel %vm583_vm5, %v985_v48, %v984_v46  ;;  %v941_v56 = vsel %vm519_vm4, %v940_v6, %v939_v59  ;;  %v658_v46 = vmul.f32 %v657_v26, %v1703_v24  ;;  %v574_v48 = vsel %vm519_vm4, %v573_v4, %v1921_v9 }
 0x121   :  { %v988_v17 = vadd.f32 %v986_v62, %v925_v54  ;;  %v2068_v55 = vpop.permute.xlu1 %783  ;;  %v993_v18 = vpop.permute.xlu0 %992  ;;  %v656_v54 = vadd.f32 %v655_v39, %v622_v19  ;;  %v943_v36 = vadd.f32 %v941_v56, %v880_v41  ;;  %v713_v62 = vrot.slane %v1983_v38, 2 }
 0x122   :  { %v994_v12 = vrot.slane %v993_v18, 6  ;;  %v785_v4 = vrot.slane %v2068_v55, 2 }
 0x123   :  { %v1044_v29 = vcombine.high %v988_v17, %v988_v17  ;;  %v1051_v14 = vrot.slane %v988_v17, %v2059_v58  ;;  %v576_v17 = vadd.f32 %v574_v48, %v1909_v2  ;;  %v707_v63 = vadd.f32 %v705_v45, %v656_v54 }
 0x124   :  { %v995_v34 = vsel %vm583_vm5, %v994_v12, %v993_v18  ;;  %v776_v12 = vrot.slane %v2033_v7, 2  ;;  %v722_v2 = vrot.slane %v2017_v1, 2 }
 0x125   :  { %v997_v53 = vadd.f32 %v995_v34, %v934_v27  ;;  %v2081_v10 = vpop.permute.xlu1 %893  ;;  %v2083_v33 = vpop.permute.xlu0 %838  ;;  %1060 = vrot.lane.b32.xlu0 %v1051_v14, %s1595_s25  ;;  %v1059_v47 = vcombine.high %v1051_v14, %v1051_v14  ;;  %v1058_v5 = vrot.slane %v1044_v29, %v2059_v58  ;;  %v714_v14 = vsel %vm261_vm0, %v1983_v38, %v713_v62 }
 0x126   :  { %v895_v23 = vrot.slane %v2081_v10, 6  ;;  %v840_v20 = vrot.slane %v2083_v33, 6  ;;  %v640_v31 = vadd.f32 %v638_v28, %v576_v17  ;;  %v770_v6 = vadd.f32 %v768_v3, %v707_v63 }
 0x127   :  { %1062 = vrot.lane.b32.xlu1 %v1059_v47, %s1595_s25  ;;  %v1091_v49 = vrot.slane %v997_v53, %v2059_v58  ;;  %v1084_v60 = vcombine.high %v997_v53, %v997_v53  ;;  %v659_v34 = vadd.f32 %v658_v46, %v631_v57  ;;  %v777_v47 = vsel %vm325_vm1, %v2033_v7, %v776_v12 }
 0x128   :  { %v896_v38 = vsel %vm455_vm3, %v895_v23, %v2081_v10  ;;  %v723_v26 = vsel %vm261_vm0, %v2017_v1, %v722_v2  ;;  %v834_v42 = vadd.f32 %v832_v61, %v770_v6  ;;  %v841_v7 = vsel %vm390_vm2, %v840_v20, %v2083_v33 }
 0x129   :  { %v2101_v25 = vpop.permute.xlu1 %847  ;;  %v1002_v43 = vpop.permute.xlu0 %1001  ;;  %1064 = vrot.lane.b32.xlu0 %v1058_v5, %s1595_s25  ;;  %v1099_v44 = vcombine.high %v1091_v49, %v1091_v49  ;;  %v1098_v51 = vrot.slane %v1084_v60, %v2059_v58  ;;  %v716_v39 = vadd.f32 %v714_v14, %v659_v34  ;;  %v786_v1 = vsel %vm325_vm1, %v2068_v55, %v785_v4 }
 0x12a   :  { %v1003_v59 = vrot.slane %v1002_v43, 6  ;;  %v849_v22 = vrot.slane %v2101_v25, 6  ;;  %v898_v50 = vadd.f32 %v896_v38, %v834_v42  ;;  %v243_v57 = vstv %s2139_s28 }
 0x12b   :  { %1100 = vrot.lane.b32.xlu1 %v1091_v49, %s1595_s25  ;;  %v662_v49 = vadd.f32 %v661_v8, %v640_v31  ;;  %v779_v37 = vadd.f32 %v777_v47, %v716_v39 }
 0x12c   :  { %v1004_v9 = vsel %vm583_vm5, %v1003_v59, %v1002_v43  ;;  %v850_v16 = vsel %vm390_vm2, %v849_v22, %v2101_v25 }
 0x12d   :  { %v1006_v18 = vadd.f32 %v1004_v9, %v943_v36  ;;  %v957_v21 = vpop.permute.xlu1 %956  ;;  %v903_v24 = vpop.permute.xlu0 %902  ;;  %1102 = vrot.lane.b32.xlu0 %v1099_v44, %s1595_s25  ;;  %v725_v33 = vadd.f32 %v723_v26, %v662_v49  ;;  %v843_v43 = vadd.f32 %v841_v7, %v779_v37 }
 0x12e   :  { %v958_v32 = vrot.slane %v957_v21, 6  ;;  %v904_v0 = vrot.slane %v903_v24, 6 }
 0x12f   :  { %v1126_v27 = vcombine.high %v1006_v18, %v1006_v18  ;;  %1104 = vrot.lane.b32.xlu1 %v1098_v51, %s1595_s25  ;;  %v1133_v29 = vrot.slane %v1006_v18, %v2059_v58  ;;  %v788_v8 = vadd.f32 %v786_v1, %v725_v33 }
 0x130   :  { %v959_v5 = vsel %vm519_vm4, %v958_v32, %v957_v21  ;;  %v905_v46 = vsel %vm455_vm3, %v904_v0, %v903_v24 }
 0x131   :  { %v966_v11 = vpop.permute.xlu1 %965  ;;  %v912_v35 = vpop.permute.xlu0 %911  ;;  %1142 = vrot.lane.b32.xlu0 %v1133_v29, %s1595_s25  ;;  %v1141_v53 = vcombine.high %v1133_v29, %v1133_v29  ;;  %v1140_v19 = vrot.slane %v1126_v27, %v2059_v58  ;;  %v961_v48 = vadd.f32 %v959_v5, %v898_v50  ;;  %v907_v36 = vadd.f32 %v905_v46, %v843_v43  ;;  %v1522_v27 = vld [vmem:[#allocation2] sm:$0x3f] }
 0x132   :  { %v967_v10 = vrot.slane %v966_v11, 6  ;;  %v913_v41 = vrot.slane %v912_v35, 6  ;;  %v852_v17 = vadd.f32 %v850_v16, %v788_v8  ;;  %v244_v29 = vmul.f32 %v1522_v27, %v243_v57  ;;  %v1523_v16 = vld [vmem:[#allocation3] sm:$0x3f] }
 0x133   :  { %1144 = vrot.lane.b32.xlu1 %v1141_v53, %s1595_s25 }
 0x134   :  { %v968_v40 = vsel %vm519_vm4, %v967_v10, %v966_v11  ;;  %v914_v62 = vsel %vm455_vm3, %v913_v41, %v912_v35 }
 0x135   :  { %v975_v56 = vpop.permute.xlu1 %974  ;;  %v1020_v52 = vpop.permute.xlu0 %1019  ;;  %1146 = vrot.lane.b32.xlu0 %v1140_v19, %s1595_s25  ;;  %v970_v18 = vadd.f32 %v968_v40, %v907_v36  ;;  %v916_v28 = vadd.f32 %v914_v62, %v852_v17 }
 0x136   :  { %v1021_v60 = vrot.slane %v1020_v52, 6  ;;  %v976_v59 = vrot.slane %v975_v56, 6 }
 0x138   :  { %v1022_v54 = vsel %vm583_vm5, %v1021_v60, %v1020_v52  ;;  %v977_v24 = vsel %vm519_vm4, %v976_v59, %v975_v56  ;;  %v651_v52 = vstv %s2167_s29 }
 0x139   :  { %v1024_v44 = vadd.f32 %v1022_v54, %v961_v48  ;;  %v1038_v55 = vpop.permute.xlu1 %1037  ;;  %v1029_v45 = vpop.permute.xlu0 %1028  ;;  %v979_v20 = vadd.f32 %v977_v24, %v916_v28  ;;  %v652_v40 = vmul.f32 %v1523_v16, %v651_v52 }
 0x13a   :  { %v1039_v15 = vrot.slane %v1038_v55, 6  ;;  %v1030_v9 = vrot.slane %v1029_v45, 6 }
 0x13b   :  { %v1197_v21 = vcombine.high %v1024_v44, %v1024_v44  ;;  %v1204_v25 = vrot.slane %v1024_v44, %v2059_v58 }
 0x13c   :  { %v1031_v51 = vsel %vm583_vm5, %v1030_v9, %v1029_v45  ;;  %v1040_v2 = vsel %vm583_vm5, %v1039_v15, %v1038_v55 }
 0x13d   :  { %v1033_v3 = vadd.f32 %v1031_v51, %v970_v18  ;;  %1213 = vrot.lane.b32.xlu1 %v1204_v25, %s1595_s25  ;;  %v1212_v12 = vcombine.high %v1204_v25, %v1204_v25  ;;  %v287_v23 = vpop.permute.xlu0 %286  ;;  %v351_v63 = vpop.permute.xlu1 %350  ;;  %v1211_v32 = vrot.slane %v1197_v21, %v2059_v58  ;;  %v1042_v34 = vadd.f32 %v1040_v2, %v979_v20 }
 0x13e   :  { %v288_v14 = vrot.slane %v287_v23, 2  ;;  %v352_v61 = vrot.slane %v351_v63, 2 }
 0x13f   :  { %1215 = vrot.lane.b32.xlu0 %v1212_v12, %s1595_s25  ;;  %v1246_v31 = vrot.slane %v1033_v3, %v2059_v58  ;;  %v1239_v11 = vcombine.high %v1033_v3, %v1033_v3  ;;  %v1288_v19 = vrot.slane %v1042_v34, %v2059_v58  ;;  %v1281_v56 = vcombine.high %v1042_v34, %v1042_v34 }
 0x140   :  { %v289_v6 = vsel %vm261_vm0, %v287_v23, %v288_v14  ;;  %v353_v35 = vsel %vm325_vm1, %v351_v63, %v352_v61 }
 0x141   :  { %1217 = vrot.lane.b32.xlu1 %v1211_v32, %s1595_s25  ;;  %v416_v53 = vpop.permute.xlu0 %415  ;;  %v481_v47 = vpop.permute.xlu1 %480  ;;  %v291_v4 = vadd.f32 %v289_v6, %v244_v29  ;;  %v1254_v39 = vcombine.high %v1246_v31, %v1246_v31  ;;  %v1253_v7 = vrot.slane %v1239_v11, %v2059_v58  ;;  %v1296_v41 = vcombine.high %v1288_v19, %v1288_v19 }
 0x142   :  { %v417_v38 = vrot.slane %v416_v53, 6  ;;  %v482_v0 = vrot.slane %v481_v47, 6  ;;  %v1295_v54 = vrot.slane %v1281_v56, %v2059_v58 }
 0x143   :  { %1255 = vrot.lane.b32.xlu0 %v1246_v31, %s1595_s25  ;;  %v355_v26 = vadd.f32 %v353_v35, %v291_v4 }
 0x144   :  { %v418_v42 = vsel %vm390_vm2, %v417_v38, %v416_v53  ;;  %v483_v22 = vsel %vm455_vm3, %v482_v0, %v481_v47 }
 0x145   :  { %1257 = vrot.lane.b32.xlu1 %v1254_v39, %s1595_s25  ;;  %v545_v5 = vpop.permute.xlu0 %544  ;;  %v609_v10 = vpop.permute.xlu1 %608  ;;  %v420_v49 = vadd.f32 %v418_v42, %v355_v26 }
 0x146   :  { %v546_v37 = vrot.slane %v545_v5, 6  ;;  %v610_v50 = vrot.slane %v609_v10, 6 }
 0x147   :  { %1259 = vrot.lane.b32.xlu0 %v1253_v7, %s1595_s25  ;;  %v485_v1 = vadd.f32 %v483_v22, %v420_v49 }
 0x148   :  { %v547_v46 = vsel %vm519_vm4, %v546_v37, %v545_v5  ;;  %v611_v60 = vsel %vm583_vm5, %v610_v50, %v609_v10 }
 0x149   :  { %1297 = vrot.lane.b32.xlu1 %v1288_v19, %s1595_s25  ;;  %v694_v33 = vpop.permute.xlu0 %693  ;;  %v757_v43 = vpop.permute.xlu1 %756  ;;  %v549_v48 = vadd.f32 %v547_v46, %v485_v1 }
 0x14a   :  { %v695_v59 = vrot.slane %v694_v33, 2  ;;  %v758_v8 = vrot.slane %v757_v43, 2 }
 0x14b   :  { %1299 = vrot.lane.b32.xlu0 %v1296_v41, %s1595_s25  ;;  %v613_v36 = vadd.f32 %v611_v60, %v549_v48 }
 0x14c   :  { %v696_v44 = vsel %vm261_vm0, %v694_v33, %v695_v59  ;;  %v759_v9 = vsel %vm325_vm1, %v757_v43, %v758_v8  ;;  %v2210_v59 = vand.u32 127, %v141_v13 }
 0x14d   :  { %1301 = vrot.lane.b32.xlu1 %v1295_v54, %s1595_s25  ;;  %v821_v55 = vpop.permute.xlu0 %820  ;;  %v885_v45 = vpop.permute.xlu1 %884  ;;  %v653_v62 = vadd.f32 %v652_v40, %v613_v36 }
 0x14e   :  { %v822_v15 = vrot.slane %v821_v55, 6  ;;  %v886_v57 = vrot.slane %v885_v45, 6  ;;  %v143_v36 = vadd.s32 128, %v2210_v59  ;;  %vm1114_vm6 = vcmp.lt.s32.totalorder %v2210_v59, 2 }
 0x14f   :  { %v698_v17 = vadd.f32 %v696_v44, %v653_v62  ;;  %vm1074_vm7 = vcmp.lt.s32.totalorder %v2210_v59, 3  ;;  %vm1156_vm8 = vcmp.lt.s32.totalorder %v2210_v59, 1  ;;  %vm1227_vm15 = vcmp.lt.s32.totalorder %v2210_v59, 127 }
 0x150   :  { %v823_v18 = vsel %vm390_vm2, %v822_v15, %v821_v55  ;;  %v887_v28 = vsel %vm455_vm3, %v886_v57, %v885_v45  ;;  %v2214_v55 = vand.u32 15, %v2210_v59  ;;  %v2216_v45 = vand.u32 15, %v143_v36 }
 0x151   :  { %v948_v21 = vpop.permute.xlu0 %947  ;;  %v1011_v25 = vpop.permute.xlu1 %1010  ;;  %v761_v24 = vadd.f32 %v759_v9, %v698_v17  ;;  %vm1269_vm2 = vcmp.lt.s32.totalorder %v2210_v59, 126 }
 0x152   :  { %v949_v51 = vrot.slane %v948_v21, 6  ;;  %v1012_v3 = vrot.slane %v1011_v25, 6  ;;  %vm170_vm9 = vcmp.ge.s32.totalorder %v2214_v55, 2  ;;  %vm171_vm10 = vcmp.ge.s32.totalorder %v2216_v45, 2 }
 0x153   :  { %v825_v12 = vadd.f32 %v823_v18, %v761_v24  ;;  %vm168_vm11 = vcmp.ge.s32.totalorder %v2214_v55, 3  ;;  %vm169_vm12 = vcmp.ge.s32.totalorder %v2216_v45, 3  ;;  %vm172_vm13 = vcmp.ge.s32.totalorder %v2214_v55, 1 }
 0x154   :  { %v950_v23 = vsel %vm519_vm4, %v949_v51, %v948_v21  ;;  %v1013_v2 = vsel %vm583_vm5, %v1012_v3, %v1011_v25  ;;  %vm173_vm14 = vcmp.ge.s32.totalorder %v2216_v45, 1  ;;  %vm174_vm0 = vcmp.lt.s32.totalorder %v2214_v55, 15 }
 0x155   :  { %v889_v63 = vadd.f32 %v887_v28, %v825_v12  ;;  %vm175_vm1 = vcmp.lt.s32.totalorder %v2216_v45, 15  ;;  %vm176_vm3 = vcmp.lt.s32.totalorder %v2214_v55, 14  ;;  %vm177_vm5 = vcmp.lt.s32.totalorder %v2216_v45, 14 }
 0x157   :  { %v952_v27 = vadd.f32 %v950_v23, %v889_v63 }
 0x159   :  { %v1015_v29 = vadd.f32 %v1013_v2, %v952_v27 }
 0x15b   :  { %v1168_v14 = vcombine.high %v1015_v29, %v1015_v29  ;;  %v1175_v61 = vrot.slane %v1015_v29, %v2059_v58 }
 0x15d   :  { %v1182_v20 = vrot.slane %v1168_v14, %v2059_v58  ;;  %v1183_v32 = vcombine.high %v1175_v61, %v1175_v61  ;;  %1184 = vrot.lane.b32.xlu0 %v1175_v61, %s1595_s25 }
 0x15f   :  { %1186 = vrot.lane.b32.xlu1 %v1183_v32, %s1595_s25 }
 0x161   :  { %1188 = vrot.lane.b32.xlu0 %v1182_v20, %s1595_s25  ;;  %s1600_s25 = smov 1  }
 0x197   :  { %v1061_v31 = vpop.permute.xlu0 %1060 }
 0x199   :  { %v1063_v6 = vpop.permute.xlu1 %1062 }
 0x19a   :  { %v1066_v34 = vsel %vm519_vm4, %v1061_v31, %v1063_v6 }
 0x19b   :  { %1070 = vrot.lane.b32.xlu0 %v1066_v34, %s1598_s30  ;;  %v1065_v11 = vpop.permute.xlu0 %1064 }
 0x19c   :  { %v1067_v35 = vsel %vm519_vm4, %v1063_v6, %v1065_v11 }
 0x19d   :  { %v1101_v53 = vpop.permute.xlu1 %1100  ;;  %1072 = vrot.lane.b32.xlu1 %v1067_v35, %s1598_s30 }
 0x19f   :  { %v1103_v47 = vpop.permute.xlu0 %1102 }
 0x1a0   :  { %v1106_v58 = vsel %vm519_vm4, %v1101_v53, %v1103_v47 }
 0x1a1   :  { %v1105_v4 = vpop.permute.xlu1 %1104  ;;  %1110 = vrot.lane.b32.xlu0 %v1106_v58, %s1599_s4 }
 0x1a2   :  { %v1107_v38 = vsel %vm519_vm4, %v1103_v47, %v1105_v4 }
 0x1a3   :  { %1112 = vrot.lane.b32.xlu1 %v1107_v38, %s1599_s4  ;;  %v1143_v0 = vpop.permute.xlu0 %1142 }
 0x1a5   :  { %v1145_v39 = vpop.permute.xlu1 %1144 }
 0x1a6   :  { %v1148_v26 = vsel %vm519_vm4, %v1143_v0, %v1145_v39 }
 0x1a7   :  { %1152 = vrot.lane.b32.xlu0 %v1148_v26, %s1600_s25  ;;  %v1147_v42 = vpop.permute.xlu0 %1146 }
 0x1a8   :  { %v1149_v19 = vsel %vm519_vm4, %v1145_v39, %v1147_v42 }
 0x1a9   :  { %1154 = vrot.lane.b32.xlu1 %v1149_v19, %s1600_s25 }
 0x1af   :  { %v1214_v7 = vpop.permute.xlu1 %1213 }
 0x1b1   :  { %v1216_v22 = vpop.permute.xlu0 %1215 }
 0x1b2   :  { %v1219_v5 = vsel %vm519_vm4, %v1214_v7, %v1216_v22 }
 0x1b3   :  { %v1218_v10 = vpop.permute.xlu1 %1217  ;;  %1223 = vrot.lane.b32.xlu1 %v1219_v5, %s1601_s5 }
 0x1b4   :  { %v1220_v49 = vsel %vm519_vm4, %v1216_v22, %v1218_v10 }
 0x1b5   :  { %1225 = vrot.lane.b32.xlu0 %v1220_v49, %s1601_s5  ;;  %v1256_v37 = vpop.permute.xlu0 %1255 }
 0x1b7   :  { %v1258_v50 = vpop.permute.xlu1 %1257 }
 0x1b8   :  { %v1261_v56 = vsel %vm519_vm4, %v1256_v37, %v1258_v50 }
 0x1b9   :  { %1265 = vrot.lane.b32.xlu1 %v1261_v56, %s1602_s7  ;;  %v1260_v52 = vpop.permute.xlu0 %1259 }
 0x1ba   :  { %v1262_v1 = vsel %vm519_vm4, %v1258_v50, %v1260_v52 }
 0x1bb   :  { %v1298_v46 = vpop.permute.xlu1 %1297  ;;  %1267 = vrot.lane.b32.xlu0 %v1262_v1, %s1602_s7 }
 0x1bd   :  { %v1300_v41 = vpop.permute.xlu0 %1299 }
 0x1be   :  { %v1303_v60 = vsel %vm519_vm4, %v1298_v46, %v1300_v41 }
 0x1bf   :  { %v1302_v33 = vpop.permute.xlu1 %1301  ;;  %1307 = vrot.lane.b32.xlu1 %v1303_v60, %s1603_s8 }
 0x1c0   :  { %v1304_v43 = vsel %vm519_vm4, %v1300_v41, %v1302_v33  ;;  %v1604_v41 = vmov 1966171168  }
 0x1c1   :  { %1309 = vrot.lane.b32.xlu0 %v1304_v43, %s1603_s8  ;;  %v1336_v60 = vunpack.c.l.s4 %v1604_v41 }
 0x1c3   :  { %v1337_v43 = vunpack.c.0.s8 %v1336_v60 }
 0x1cf   :  { %v1185_v48 = vpop.permute.xlu0 %1184 }
 0x1d1   :  { %v1187_v16 = vpop.permute.xlu1 %1186 }
 0x1d2   :  { %v1190_v35 = vsel %vm519_vm4, %v1185_v48, %v1187_v16 }
 0x1d3   :  { %v1189_v40 = vpop.permute.xlu0 %1188 }
 0x1d4   :  { %v1191_v53 = vsel %vm519_vm4, %v1187_v16, %v1189_v40 }
 0x20d   :  { %v1071_v8 = vpop.permute.xlu0 %1070 }
 0x20f   :  { %v1073_v54 = vpop.permute.xlu1 %1072 }
 0x210   :  { %v1075_v17 = vsel %vm1074_vm7, %v1071_v8, %v1073_v54  ;;  %v1076_v18 = vsel %vm1074_vm7, %v1073_v54, %v1071_v8  ;;  %vm178_vm7 = vcmp.lt.s32.totalorder %v2214_v55, 13  ;;  %v1340_v8 = vsub.s32 %v1337_v43, %v2045_v30 }
 0x211   :  { %v1081_v28 = vsel %vm168_vm11, %v1076_v18, 0.0  ;;  %v1082_v3 = vsel %vm169_vm12, %v1075_v17, 0.0  ;;  %v1359_v55 = vsub.s32 0, %v2045_v30  ;;  %v1330_v17 = vld [vmem:[#allocation4] sm:$0xff] }
 0x213   :  { %v1111_v62 = vpop.permute.xlu0 %1110 }
 0x215   :  { %v1113_v44 = vpop.permute.xlu1 %1112 }
 0x216   :  { %v1115_v13 = vsel %vm1114_vm6, %v1111_v62, %v1113_v44  ;;  %v1116_v9 = vsel %vm1114_vm6, %v1113_v44, %v1111_v62  ;;  %vm1311_vm6 = vcmp.lt.s32.totalorder %v2210_v59, 125 }
 0x217   :  { %v1121_v24 = vsel %vm170_vm9, %v1116_v9, 0.0  ;;  %v1122_v51 = vsel %vm171_vm10, %v1115_v13, 0.0 }
 0x218   :  { %v1123_v27 = vadd.f32 %v1121_v24, %v1081_v28  ;;  %v1124_v29 = vadd.f32 %v1122_v51, %v1082_v3  ;;  %v1331_v24 = vld [vmem:[#allocation4 + $0x8] sm:$0xff] }
 0x219   :  { %v1153_v57 = vpop.permute.xlu0 %1152 }
 0x21b   :  { %v1155_v15 = vpop.permute.xlu1 %1154 }
 0x21c   :  { %v1157_v21 = vsel %vm1156_vm8, %v1153_v57, %v1155_v15  ;;  %v1158_v25 = vsel %vm1156_vm8, %v1155_v15, %v1153_v57  ;;  %vm179_vm8 = vcmp.lt.s32.totalorder %v2216_v45, 13  ;;  %v1363_v45 = vsub.s32 1, %v2045_v30 }
 0x21d   :  { %v1163_v12 = vsel %vm172_vm13, %v1158_v25, 0.0  ;;  %v1164_v23 = vsel %vm173_vm14, %v1157_v21, 0.0 }
 0x21e   :  { %v1165_v14 = vadd.f32 %v1163_v12, %v1123_v27  ;;  %v1166_v61 = vadd.f32 %v1164_v23, %v1124_v29 }
 0x220   :  { %v1194_v4 = vadd.f32 %v1190_v35, %v1165_v14  ;;  %v1195_v38 = vadd.f32 %v1191_v53, %v1166_v61 }
 0x225   :  { %v1224_v63 = vpop.permute.xlu1 %1223 }
 0x227   :  { %v1226_v2 = vpop.permute.xlu0 %1225 }
 0x228   :  { %v1228_v20 = vsel %vm1227_vm15, %v1224_v63, %v1226_v2  ;;  %v1229_v32 = vsel %vm1227_vm15, %v1226_v2, %v1224_v63 }
 0x229   :  { %v1234_v47 = vsel %vm174_vm0, %v1228_v20, 0.0  ;;  %v1235_v58 = vsel %vm175_vm1, %v1229_v32, 0.0 }
 0x22a   :  { %v1236_v26 = vadd.f32 %v1234_v47, %v1194_v4  ;;  %v1237_v42 = vadd.f32 %v1235_v58, %v1195_v38 }
 0x22b   :  { %v1266_v31 = vpop.permute.xlu1 %1265 }
 0x22d   :  { %v1268_v6 = vpop.permute.xlu0 %1267 }
 0x22e   :  { %v1270_v34 = vsel %vm1269_vm2, %v1266_v31, %v1268_v6  ;;  %v1271_v11 = vsel %vm1269_vm2, %v1268_v6, %v1266_v31 }
 0x22f   :  { %v1276_v0 = vsel %vm176_vm3, %v1270_v34, 0.0  ;;  %v1277_v39 = vsel %vm177_vm5, %v1271_v11, 0.0 }
 0x230   :  { %v1278_v22 = vadd.f32 %v1276_v0, %v1236_v26  ;;  %v1279_v5 = vadd.f32 %v1277_v39, %v1237_v42 }
 0x231   :  { %v1308_v19 = vpop.permute.xlu1 %1307 }
 0x233   :  { %v1310_v7 = vpop.permute.xlu0 %1309 }
 0x234   :  { %v1312_v10 = vsel %vm1311_vm6, %v1308_v19, %v1310_v7  ;;  %v1313_v49 = vsel %vm1311_vm6, %v1310_v7, %v1308_v19 }
 0x235   :  { %v1318_v37 = vsel %vm178_vm7, %v1312_v10, 0.0  ;;  %v1319_v50 = vsel %vm179_vm8, %v1313_v49, 0.0 }
 0x236   :  { %v1320_v56 = vadd.f32 %v1318_v37, %v1278_v22  ;;  %v1321_v52 = vadd.f32 %v1319_v50, %v1279_v5 }
 0x238   :  { %v1322_v1 = vmul.f32 0.5, %v1320_v56  ;;  %v1323_v46 = vmul.f32 0.5, %v1321_v52 }
 0x23a   :  { %1518 = vtanh.f32 %v1322_v1 }
 0x23b   :  { %1520 = vtanh.f32 %v1323_v46 }
 0x244   :  { %v1519_v33 = vpop.eup %1518 }
 0x245   :  { %v1521_v48 = vpop.eup %1520  ;;  %v1326_v16 = vmul.f32 0.5, %v1519_v33 }
 0x246   :  { %v1327_v40 = vmul.f32 0.5, %v1521_v48 }
 0x247   :  { %v1328_v59 = vadd.f32 0.5, %v1326_v16 }
 0x248   :  { %v1329_v54 = vadd.f32 0.5, %v1327_v40 }
 0x24a   :  { %v1334_v36 = vcombine.low %v1328_v59, %v1329_v54 }
 0x24c   :  { %v1341_v44 = vrot.slane %v1334_v36, %v1340_v8 }
 0x24e   :  { %v1342_v62 = vcombine.high %v1341_v44, %v1341_v44  ;;  %v1349_v15 = vrot.slane %v1341_v44, %v1340_v8 }
 0x250   :  { %v1356_v13 = vrot.slane %v1342_v62, %v1340_v8  ;;  %v1360_v9 = vrot.slane %v1349_v15, %v1359_v55  ;;  %v1364_v57 = vrot.slane %v1349_v15, %v1363_v45 }
 0x252   :  { %v1368_v18 = vrot.slane %v1356_v13, %v1359_v55  ;;  %v1372_v21 = vrot.slane %v1356_v13, %v1363_v45  ;;  %v1373_v25 = vcombine.low %v1360_v9, %v1364_v57 }
 0x254   :  { %v1374_v51 = vcombine.low %v1368_v18, %v1372_v21  ;;  %v1377_v28 = vmul.f32 %v1373_v25, %v1330_v17 }
 0x256   :  { %v1378_v3 = vmul.f32 %v1374_v51, %v1331_v24  ;;  %1379 = vst [vmem:[#allocation9] sm:$0xff] %v1377_v28 }
 0x258   :  { %1380 = vst [vmem:[#allocation9 + $0x8] sm:$0xff] %v1378_v3 }
 0x259   :  { %1569 = shalt.err (!%p1566_p3)
}
 0x25a   :  { %s1570_s16 = scalar_lea.hbm %s2258_s2, 256 }
 0x25b   :  { %p1571_p4 = scmp.ne.s32.totalorder %s2258_s2, %s1570_s16  ;;  %p1574_p5 = scmp.lt.u32.totalorder %s1570_s16, %s2258_s2 }
 0x25d   :  { %p1576_p6 = pnand %p1574_p5, %p1571_p4 }
 0x25f   :  { %1579 = shalt.err (!%p1576_p6)
}
 0x260   :  { %1392 = dma.vmem_to_hbm [thread:$0]  %s1387_s11, 256, %s2258_s2, [#allocation6], %s1587_s1, %s1587_s1, %s1588_s22  }
 0x261   :  { %1584 = dma.done.wait [#allocation6], 256  }
 0x262   :  { %1585 = vsyncadd [#allocation6], 4294967040 }
 0x263   :  { %1396 = vsyncpa [#allocation5], 1 }
 0x264   :  { %1397 = vsyncpa [#allocation6], 1 }
 0x265   :  { %1398 = vsyncpa [#allocation7], 1 }

</bundles_post_ra>
